<compile_context>
chip_gen: v6e
topology: v6e:2x2x1
jax: 0.10.0
libtpu: 0.0.40
codegen_flags: <defaults>
</compile_context>

<pallas_src>
import jax
import jax.numpy as jnp
import numpy as np
from jax.experimental import pallas as pl
from jax.experimental.pallas import tpu as pltpu

# MultiDiscrete action space nvec for a 10x10 microrts map:
# [source unit (100), action type (6), move dir, harvest dir, return dir,
#  produce dir, produce type (7), relative attack position (49)]
NVEC = (100, 6, 4, 4, 4, 4, 7, 49)
SUM_NVEC = sum(NVEC)                 # 178
HEAD_OUT = 256                       # lane-dense output slab: [logits(178), value(1), pad]

# Fixed network geometry (10x10 map, 27 feature planes).
IN_H = IN_W = 10
IN_C = 27
C1_OUT, K1, S1 = 10, 3, 2
OH1 = OW1 = (IN_H - K1) // S1 + 1    # 4
C2_OUT, K2 = 20, 2
OH2 = OW2 = OH1 - K2 + 1             # 3
K1_REACH = (OH1 - 1) * S1 + K1       # 9: input pixels actually read by conv1
D_IN = K1_REACH * K1_REACH * IN_C    # 2187 (NHWC flatten of the trimmed 9x9 input)
D_H1 = OH1 * OW1 * C1_OUT            # 160  ((oh,ow,c) order)
D_H2 = C2_OUT * OH2 * OW2            # 180  (NCHW flatten order)
D_FC = 180
HID = 256                            # zero-padded hidden width (full lane tiles)


# ---------------------------------------------------------------------------
# Pallas kernel: whole forward pass, fused (bf16 operands, f32 accumulation)
# ---------------------------------------------------------------------------
def _fused_agent_kernel(x_ref, m1_ref, m2_ref, m3_ref, m4_ref, b_ref, out_ref):
    """out = relu(relu(relu(x@M1+b0)@M2+b1)@M3+b2) @ M4 + b3 (all padded to 256)."""
    b = b_ref[...]                                                    # (4, 256) f32
    h = jnp.dot(x_ref[...], m1_ref[...], preferred_element_type=jnp.float32)
    h = jnp.maximum(h + b[0:1, :], 0.0).astype(jnp.bfloat16)          # conv1 + ReLU
    h = jnp.dot(h, m2_ref[...], preferred_element_type=jnp.float32)
    h = jnp.maximum(h + b[1:2, :], 0.0).astype(jnp.bfloat16)          # conv2 + ReLU (NCHW flat)
    h = jnp.dot(h, m3_ref[...], preferred_element_type=jnp.float32)
    h = jnp.maximum(h + b[2:3, :], 0.0).astype(jnp.bfloat16)          # fc + ReLU
    out = jnp.dot(h, m4_ref[...], preferred_element_type=jnp.float32) + b[3:4, :]
    out_ref[...] = out.astype(out_ref.dtype)                          # merged actor+critic


def _choose_batch_tile(bsz):
    """Single block (weights fetched once) at small/moderate batch; >=2 blocks
    (megacore-shardable, 512-row cap) at large batch."""
    if bsz <= 256:
        return bsz
    tb = min(512, pl.cdiv(bsz, 2))
    return ((tb + 7) // 8) * 8       # sublane multiple


def _fused_forward(xflat, kp):
    bsz, d_in = xflat.shape
    tb = _choose_batch_tile(bsz)
    grid = (pl.cdiv(bsz, tb),)

    def resident(arr):               # constant index map -> stays in VMEM across steps
        nd = arr.ndim
        return pl.BlockSpec(arr.shape, lambda i, _nd=nd: (0,) * _nd)

    weight_bytes = 2 * (kp["m1"].size + kp["m2"].size + kp["m3"].size + kp["m4"].size) \
        + 4 * kp["bias"].size
    flops = 2 * bsz * (D_IN * D_H1 + D_H1 * D_H2 + D_H2 * D_FC + D_FC * (SUM_NVEC + 1))
    bytes_accessed = weight_bytes + bsz * (d_in * 2 + HEAD_OUT * 4)

    return pl.pallas_call(
        _fused_agent_kernel,
        out_shape=jax.ShapeDtypeStruct((bsz, HEAD_OUT), jnp.float32),
        grid_spec=pltpu.PrefetchScalarGridSpec(
            num_scalar_prefetch=0,
            grid=grid,
            in_specs=[pl.BlockSpec((tb, d_in), lambda i: (i, 0)),
                      resident(kp["m1"]), resident(kp["m2"]),
                      resident(kp["m3"]), resident(kp["m4"]),
                      resident(kp["bias"])],
            out_specs=pl.BlockSpec((tb, HEAD_OUT), lambda i: (i, 0)),
        ),
        compiler_params=pltpu.CompilerParams(
            dimension_semantics=("parallel",),
            vmem_limit_bytes=48 * 1024 * 1024),
        cost_estimate=pl.CostEstimate(flops=flops, transcendentals=0,
                                      bytes_accessed=bytes_accessed),
    )(xflat, kp["m1"], kp["m2"], kp["m3"], kp["m4"], kp["bias"])


# ---------------------------------------------------------------------------
# Parameter setup (PyTorch-shaped params -> kernel-ready weights, once)
# ---------------------------------------------------------------------------
def init_params(key):
    ks = jax.random.split(key, 10)

    def rnd(k, shape, scale=0.1):
        return scale * jax.random.normal(k, shape, dtype=jnp.float32)

    # Shapes follow the PyTorch module exactly (conv: OIHW, linear: (out, in)).
    return {
        "conv1_w": rnd(ks[0], (C1_OUT, IN_C, K1, K1)),
        "conv1_b": rnd(ks[1], (C1_OUT,)),
        "conv2_w": rnd(ks[2], (C2_OUT, C1_OUT, K2, K2)),
        "conv2_b": rnd(ks[3], (C2_OUT,)),
        "fc_w": rnd(ks[4], (D_FC, D_H2)),
        "fc_b": rnd(ks[5], (D_FC,)),
        "actor_w": rnd(ks[6], (SUM_NVEC, D_FC), scale=0.01),
        "actor_b": rnd(ks[7], (SUM_NVEC,)),
        "critic_w": rnd(ks[8], (1, D_FC)),
        "critic_b": rnd(ks[9], (1,)),
    }


def prepare_params(params):
    """One-time layout prep (NOT per forward call): bake the convs into dense
    matmul weights (bf16), fold the NCHW flatten into the layer ordering,
    zero-pad hidden widths to 256, merge actor+critic into one lane-dense
    (256, 256) head matrix, and pack all biases into a single (4, 256) array."""
    w1 = np.asarray(params["conv1_w"], dtype=np.float32)   # (10, 27, 3, 3) OIHW
    b1 = np.asarray(params["conv1_b"], dtype=np.float32)
    w2 = np.asarray(params["conv2_w"], dtype=np.float32)   # (20, 10, 2, 2)
    b2 = np.asarray(params["conv2_b"], dtype=np.float32)
    fc_w = np.asarray(params["fc_w"], dtype=np.float32)    # (180, 180)
    fc_b = np.asarray(params["fc_b"], dtype=np.float32)
    aw = np.asarray(params["actor_w"], dtype=np.float32)   # (178, 180)
    ab = np.asarray(params["actor_b"], dtype=np.float32)
    cw = np.asarray(params["critic_w"], dtype=np.float32)  # (1, 180)
    cb = np.asarray(params["critic_b"], dtype=np.float32)

    # conv1 over the fixed grid as a dense (2187, 256) matrix.  Input columns
    # index the trimmed 9x9 NHWC slice: (h*9 + w)*27 + c (h,w in [0,8]).
    # Output columns: (oh*OW1 + ow)*C1 + o  (position-major, channel-minor).
    m1 = np.zeros((D_IN, HID), dtype=np.float32)
    for oh in range(OH1):
        for ow in range(OW1):
            col = (oh * OW1 + ow) * C1_OUT
            for i in range(K1):
                for j in range(K1):
                    h, w = S1 * oh + i, S1 * ow + j
                    row = (h * K1_REACH + w) * IN_C
                    m1[row:row + IN_C, col:col + C1_OUT] = w1[:, :, i, j].T  # (c, o)

    # conv2 over the fixed 4x4 grid as a dense (256, 256) matrix.  Output
    # columns follow PyTorch's NCHW flatten (o2*9 + oh2*3 + ow2) so fc_w is
    # consumed un-permuted.
    m2 = np.zeros((HID, HID), dtype=np.float32)
    for oh2 in range(OH2):
        for ow2 in range(OW2):
            col0 = oh2 * OW2 + ow2
            for di in range(K2):
                for dj in range(K2):
                    hh, ww = oh2 + di, ow2 + dj
                    row = (hh * OW1 + ww) * C1_OUT
                    m2[row:row + C1_OUT, col0:D_H2:OH2 * OW2] = w2[:, :, di, dj].T  # (c1, o2)

    m3 = np.zeros((HID, HID), dtype=np.float32)
    m3[:D_H2, :D_FC] = fc_w.T

    # Merged actor+critic head (zero-padded): logits at [:178], value at 178.
    m4 = np.zeros((HID, HEAD_OUT), dtype=np.float32)
    m4[:D_FC, :SUM_NVEC] = aw.T
    m4[:D_FC, SUM_NVEC] = cw[0]

    # All four biases packed in one f32 (4, 256) array -> single DMA.
    bias = np.zeros((4, HID), dtype=np.float32)
    bias[0, :D_H1] = np.tile(b1, OH1 * OW1)
    bias[1, :D_H2] = np.repeat(b2, OH2 * OW2)
    bias[2, :D_FC] = fc_b
    bias[3, :SUM_NVEC] = ab
    bias[3, SUM_NVEC] = cb[0]

    return {
        "m1": jnp.asarray(m1, dtype=jnp.bfloat16),
        "m2": jnp.asarray(m2, dtype=jnp.bfloat16),
        "m3": jnp.asarray(m3, dtype=jnp.bfloat16),
        "m4": jnp.asarray(m4, dtype=jnp.bfloat16),
        "bias": jnp.asarray(bias, dtype=jnp.float32),
    }


# ---------------------------------------------------------------------------
# Forward (equivalent of Agent.forward + critic value)
# ---------------------------------------------------------------------------
@jax.jit
def agent_forward(kernel_params, x_nhwc):
    """Returns split_logits (tuple, split by NVEC) + critic value."""
    bsz = x_nhwc.shape[0]
    # conv1 (3x3, stride 2) never reads pixels with h==9 or w==9: trim them,
    # flatten NHWC -> (B, 2187) and cast to bf16 (MXU-native operand stream).
    xflat = x_nhwc[:, :K1_REACH, :K1_REACH, :].reshape(bsz, D_IN).astype(jnp.bfloat16)
    out = _fused_forward(xflat, kernel_params)             # (B, 256) lane-dense slab
    logits = out[:, :SUM_NVEC]
    value = out[:, SUM_NVEC:SUM_NVEC + 1]
    splits, off = [], 0
    for n in NVEC:                                         # torch.split(logits, nvec, 1)
        splits.append(logits[:, off:off + n])
        off += n
    return tuple(splits), value


# ---------------------------------------------------------------------------
# Plain-XLA reference of the PyTorch module (for numerical verification, f32)
# ---------------------------------------------------------------------------
def reference_forward(params, x_nhwc):
    x = jnp.transpose(x_nhwc, (0, 3, 1, 2))  # NCHW, like x.permute((0,3,1,2))
    y = jax.lax.conv_general_dilated(
        x, params["conv1_w"], window_strides=(2, 2), padding="VALID",
        dimension_numbers=("NCHW", "OIHW", "NCHW"))
    y = jax.nn.relu(y + params["conv1_b"][None, :, None, None])
    y = jax.lax.conv_general_dilated(
        y, params["conv2_w"], window_strides=(1, 1), padding="VALID",
        dimension_numbers=("NCHW", "OIHW", "NCHW"))
    y = jax.nn.relu(y + params["conv2_b"][None, :, None, None])
    feat = y.reshape(x.shape[0], -1)                       # nn.Flatten (NCHW)
    h = jax.nn.relu(feat @ params["fc_w"].T + params["fc_b"])
    logits = h @ params["actor_w"].T + params["actor_b"]
    value = h @ params["critic_w"].T + params["critic_b"]
    return logits, value


# TODO(synk): get_action's masked-categorical sampling depends on env callbacks
# (vec_client.getUnitLocationMasks / getUnitActionMasks); not reproducible in a
# self-contained kernel, so only forward()/get_value() compute is implemented.

if __name__ == "__main__":
    key = jax.random.PRNGKey(0)
    pkey, xkey = jax.random.split(key)
    params = init_params(pkey)
    kernel_params = prepare_params(params)

    # Input consistent with the module: 10x10 map, 27 feature planes, NHWC.
    x = jax.random.normal(xkey, (2, IN_H, IN_W, IN_C), dtype=jnp.float32)

    split_logits, value = agent_forward(kernel_params, x)
    jax.block_until_ready((split_logits, value))

    assert len(split_logits) == len(NVEC)
    assert all(s.shape == (2, n) for s, n in zip(split_logits, NVEC))
    assert value.shape == (2, 1)

    # Numerical check against the plain-XLA f32 reference of the PyTorch module
    # (tolerance relaxed for bf16 weight/activation rounding).
    ref_logits, ref_value = reference_forward(params, x)
    got_logits = jnp.concatenate(split_logits, axis=1)
    assert np.allclose(np.asarray(got_logits), np.asarray(ref_logits),
                       atol=5e-2, rtol=5e-2)
    assert np.allclose(np.asarray(value), np.asarray(ref_value),
                       atol=5e-2, rtol=5e-2)
    print("KERNEL_OK")
</pallas_src>

<mosaic_0001>
module attributes {stable_mosaic.version = 11 : i64} {
  func.func @_fused_agent_kernel(%arg0: i32, %arg1: memref<2x2187xbf16, #tpu.memory_space<vmem>>, %arg2: memref<2187x256xbf16, #tpu.memory_space<vmem>>, %arg3: memref<256x256xbf16, #tpu.memory_space<vmem>>, %arg4: memref<256x256xbf16, #tpu.memory_space<vmem>>, %arg5: memref<256x256xbf16, #tpu.memory_space<vmem>>, %arg6: memref<4x256xf32, #tpu.memory_space<vmem>>, %arg7: memref<2x256xf32, #tpu.memory_space<vmem>>) attributes {dimension_semantics = [#tpu.dimension_semantics<parallel>], iteration_bounds = array<i64: 1>, scalar_prefetch = 0 : i64, scratch_operands = 0 : i64, tpu.core_type = #tpu.core_type<tc>, window_params = [{transform_indices = @transform_0, window_bounds = array<i64: 2, 2187>}, {pipeline_mode = #tpu.pipeline_mode<synchronous>, transform_indices = @transform_1, window_bounds = array<i64: 2187, 256>}, {pipeline_mode = #tpu.pipeline_mode<synchronous>, transform_indices = @transform_2, window_bounds = array<i64: 256, 256>}, {pipeline_mode = #tpu.pipeline_mode<synchronous>, transform_indices = @transform_3, window_bounds = array<i64: 256, 256>}, {pipeline_mode = #tpu.pipeline_mode<synchronous>, transform_indices = @transform_4, window_bounds = array<i64: 256, 256>}, {pipeline_mode = #tpu.pipeline_mode<synchronous>, transform_indices = @transform_5, window_bounds = array<i64: 4, 256>}, {transform_indices = @transform_6, window_bounds = array<i64: 2, 256>}]} {
    %c0 = arith.constant 0 : index
    %c0_0 = arith.constant 0 : index
    %0 = vector.load %arg6[%c0, %c0_0] : memref<4x256xf32, #tpu.memory_space<vmem>>, vector<4x256xf32>
    %c0_1 = arith.constant 0 : index
    %c0_2 = arith.constant 0 : index
    %1 = vector.load %arg1[%c0_1, %c0_2] : memref<2x2187xbf16, #tpu.memory_space<vmem>>, vector<2x2187xbf16>
    %c0_3 = arith.constant 0 : index
    %c0_4 = arith.constant 0 : index
    %2 = vector.load %arg2[%c0_3, %c0_4] : memref<2187x256xbf16, #tpu.memory_space<vmem>>, vector<2187x256xbf16>
    %cst = arith.constant dense<0.000000e+00> : vector<2x256xf32>
    %3 = tpu.matmul %1, %2, %cst {dimension_numbers = #tpu.dot_dimension_numbers<[1], [0], [0], [1], [0, 0, 1, 1], [], []>} : vector<2x2187xbf16>, vector<2187x256xbf16>, vector<2x256xf32> -> vector<2x256xf32>
    %4 = vector.extract_strided_slice %0 {offsets = [0, 0], sizes = [1, 256], strides = [1, 1]} : vector<4x256xf32> to vector<1x256xf32>
    %5 = vector.broadcast %4 : vector<1x256xf32> to vector<2x256xf32>
    %6 = arith.addf %3, %5 : vector<2x256xf32>
    %cst_5 = arith.constant 0.000000e+00 : f32
    %7 = vector.broadcast %cst_5 : f32 to vector<2x256xf32>
    %8 = arith.maximumf %6, %7 : vector<2x256xf32>
    %9 = arith.truncf %8 : vector<2x256xf32> to vector<2x256xbf16>
    %c0_6 = arith.constant 0 : index
    %c0_7 = arith.constant 0 : index
    %10 = vector.load %arg3[%c0_6, %c0_7] : memref<256x256xbf16, #tpu.memory_space<vmem>>, vector<256x256xbf16>
    %cst_8 = arith.constant dense<0.000000e+00> : vector<2x256xf32>
    %11 = tpu.matmul %9, %10, %cst_8 {dimension_numbers = #tpu.dot_dimension_numbers<[1], [0], [0], [1], [0, 0, 1, 1], [], []>} : vector<2x256xbf16>, vector<256x256xbf16>, vector<2x256xf32> -> vector<2x256xf32>
    %12 = vector.extract_strided_slice %0 {offsets = [1, 0], sizes = [1, 256], strides = [1, 1]} : vector<4x256xf32> to vector<1x256xf32>
    %13 = vector.broadcast %12 : vector<1x256xf32> to vector<2x256xf32>
    %14 = arith.addf %11, %13 : vector<2x256xf32>
    %cst_9 = arith.constant 0.000000e+00 : f32
    %15 = vector.broadcast %cst_9 : f32 to vector<2x256xf32>
    %16 = arith.maximumf %14, %15 : vector<2x256xf32>
    %17 = arith.truncf %16 : vector<2x256xf32> to vector<2x256xbf16>
    %c0_10 = arith.constant 0 : index
    %c0_11 = arith.constant 0 : index
    %18 = vector.load %arg4[%c0_10, %c0_11] : memref<256x256xbf16, #tpu.memory_space<vmem>>, vector<256x256xbf16>
    %cst_12 = arith.constant dense<0.000000e+00> : vector<2x256xf32>
    %19 = tpu.matmul %17, %18, %cst_12 {dimension_numbers = #tpu.dot_dimension_numbers<[1], [0], [0], [1], [0, 0, 1, 1], [], []>} : vector<2x256xbf16>, vector<256x256xbf16>, vector<2x256xf32> -> vector<2x256xf32>
    %20 = vector.extract_strided_slice %0 {offsets = [2, 0], sizes = [1, 256], strides = [1, 1]} : vector<4x256xf32> to vector<1x256xf32>
    %21 = vector.broadcast %20 : vector<1x256xf32> to vector<2x256xf32>
    %22 = arith.addf %19, %21 : vector<2x256xf32>
    %cst_13 = arith.constant 0.000000e+00 : f32
    %23 = vector.broadcast %cst_13 : f32 to vector<2x256xf32>
    %24 = arith.maximumf %22, %23 : vector<2x256xf32>
    %25 = arith.truncf %24 : vector<2x256xf32> to vector<2x256xbf16>
    %c0_14 = arith.constant 0 : index
    %c0_15 = arith.constant 0 : index
    %26 = vector.load %arg5[%c0_14, %c0_15] : memref<256x256xbf16, #tpu.memory_space<vmem>>, vector<256x256xbf16>
    %cst_16 = arith.constant dense<0.000000e+00> : vector<2x256xf32>
    %27 = tpu.matmul %25, %26, %cst_16 {dimension_numbers = #tpu.dot_dimension_numbers<[1], [0], [0], [1], [0, 0, 1, 1], [], []>} : vector<2x256xbf16>, vector<256x256xbf16>, vector<2x256xf32> -> vector<2x256xf32>
    %28 = vector.extract_strided_slice %0 {offsets = [3, 0], sizes = [1, 256], strides = [1, 1]} : vector<4x256xf32> to vector<1x256xf32>
    %29 = vector.broadcast %28 : vector<1x256xf32> to vector<2x256xf32>
    %30 = arith.addf %27, %29 : vector<2x256xf32>
    %c0_17 = arith.constant 0 : index
    %c0_18 = arith.constant 0 : index
    %31 = vector.load %arg7[%c0_17, %c0_18] : memref<2x256xf32, #tpu.memory_space<vmem>>, vector<2x256xf32>
    tpu.vector_store %arg7[%c0_17, %c0_18], %30 {strides = array<i32>} : memref<2x256xf32, #tpu.memory_space<vmem>>, vector<2x256xf32>,
    return
  }
  func.func @transform_0(%arg0: i32) -> (i32, i32) {
    %c0_i32 = arith.constant 0 : i32
    %c0_i32_0 = arith.constant 0 : i32
    return %arg0, %c0_i32 : i32, i32
  }
  func.func @transform_1(%arg0: i32) -> (i32, i32) {
    %c0_i32 = arith.constant 0 : i32
    %c0_i32_0 = arith.constant 0 : i32
    %c0_i32_1 = arith.constant 0 : i32
    return %c0_i32, %c0_i32_0 : i32, i32
  }
  func.func @transform_2(%arg0: i32) -> (i32, i32) {
    %c0_i32 = arith.constant 0 : i32
    %c0_i32_0 = arith.constant 0 : i32
    %c0_i32_1 = arith.constant 0 : i32
    return %c0_i32, %c0_i32_0 : i32, i32
  }
  func.func @transform_3(%arg0: i32) -> (i32, i32) {
    %c0_i32 = arith.constant 0 : i32
    %c0_i32_0 = arith.constant 0 : i32
    %c0_i32_1 = arith.constant 0 : i32
    return %c0_i32, %c0_i32_0 : i32, i32
  }
  func.func @transform_4(%arg0: i32) -> (i32, i32) {
    %c0_i32 = arith.constant 0 : i32
    %c0_i32_0 = arith.constant 0 : i32
    %c0_i32_1 = arith.constant 0 : i32
    return %c0_i32, %c0_i32_0 : i32, i32
  }
  func.func @transform_5(%arg0: i32) -> (i32, i32) {
    %c0_i32 = arith.constant 0 : i32
    %c0_i32_0 = arith.constant 0 : i32
    %c0_i32_1 = arith.constant 0 : i32
    return %c0_i32, %c0_i32_0 : i32, i32
  }
  func.func @transform_6(%arg0: i32) -> (i32, i32) {
    %c0_i32 = arith.constant 0 : i32
    %c0_i32_0 = arith.constant 0 : i32
    return %arg0, %c0_i32 : i32, i32
  }
}

</mosaic_0001>

<bundles_post_ra>
// kernel: agent_forward.1
= control target key start
LH: loop header
LB: loop body
LE: loop exit
PB: predicated region body
PF: predicated region fallthrough
CT: control target
= control target key end

     0   :  { %11 = vsyncpa [#allocation3], 0  ;;  %s4264_s0 = inlined_call_operand.vmem [shape: bf16[2,2187], index: 0, kind: input, shape index: {}]   ;;  %s4265_s1 = inlined_call_operand.hbm [shape: bf16[2187,256], index: 1, kind: input, shape index: {}]   ;;  %s4266_s2 = inlined_call_operand.hbm [shape: bf16[256,256], index: 2, kind: input, shape index: {}]   ;;  %s4267_s3 = inlined_call_operand.hbm [shape: bf16[256,256], index: 3, kind: input, shape index: {}]   ;;  %s4268_s4 = inlined_call_operand.hbm [shape: bf16[256,256], index: 4, kind: input, shape index: {}]   ;;  %s4269_s5 = inlined_call_operand.hbm [shape: f32[4,256], index: 5, kind: input, shape index: {}]   ;;  %s4270_s6 = inlined_call_operand.vmem [shape: f32[2,256], index: 6, kind: output, shape index: {}]  }
   0x1   :  { %12 = vsyncpa [#allocation5], 0 }
   0x2   :  { %13 = vsyncpa [#allocation8], 0  ;;  %s4107_s21 = smov [#allocation4]   ;;  %s4108_s23 = smov [#allocation7]  }
   0x3   :  { %s33_s22 = sshll.u32 %s4107_s21, 4  ;;  %s57_s24 = sshll.u32 %s4108_s23, 4  ;;  %s34_s22 = int_to_ptr.vmem [resolvable:$true] %s33_s22  ;;  %s58_s24 = int_to_ptr.vmem [resolvable:$true] %s57_s24 }
   0x4   :  { %s4009_s25 = scalar_lea.vmem %s34_s22, 4096  ;;  %p4014_p1 = scmp.lt.s32.totalorder %s34_s22, %s34_s22 }
   0x5   :  { %p4010_p0 = scmp.ne.s32.totalorder %s34_s22, %s4009_s25  ;;  %p4015_p2 = scmp.lt.s32.totalorder %s4009_s25, %s4009_s25 }
   0x7   :  { %p4016_p3 = por %p4015_p2, %p4014_p1 }
   0x9   :  { %p4017_p4 = pnand %p4016_p3, %p4010_p0 }
   0xb   :  { %4020 = shalt.err (!%p4017_p4)
}
   0xc   :  { %s4109_s26 = smov 128   ;;  %s4110_s27 = smov 8  }
   0xd   :  { %39 = dma.hbm_to_vmem [thread:$0]  %s4266_s2, 4096, %s34_s22, [#allocation5], %s4109_s26, %s4109_s26, %s4110_s27  }
   0xe   :  { %s4029_s30 = scalar_lea.vmem %s58_s24, 4096  ;;  %p4034_p6 = scmp.lt.s32.totalorder %s58_s24, %s58_s24 }
   0xf   :  { %p4030_p5 = scmp.ne.s32.totalorder %s58_s24, %s4029_s30  ;;  %p4035_p7 = scmp.lt.s32.totalorder %s4029_s30, %s4029_s30 }
  0x11   :  { %p4036_p8 = por %p4035_p7, %p4034_p6 }
  0x13   :  { %p4037_p9 = pnand %p4036_p8, %p4030_p5 }
  0x15   :  { %4040 = shalt.err (!%p4037_p9)
}
  0x16   :  { %63 = dma.hbm_to_vmem [thread:$0]  %s4268_s4, 4096, %s58_s24, [#allocation8], %s4109_s26, %s4109_s26, %s4110_s27  }
  0x17   :  { %s4111_s9 = smov [#allocation2]   ;;  %s4112_s11 = smov [#allocation6]  }
  0x18   :  { %s21_s10 = sshll.u32 %s4111_s9, 4  ;;  %s45_s12 = sshll.u32 %s4112_s11, 4  ;;  %s22_s10 = int_to_ptr.vmem [resolvable:$true] %s21_s10  ;;  %s46_s12 = int_to_ptr.vmem [resolvable:$true] %s45_s12 }
  0x19   :  { %s4049_s2 = scalar_lea.vmem %s22_s10, 35072  ;;  %p4054_p11 = scmp.lt.s32.totalorder %s22_s10, %s22_s10 }
  0x1a   :  { %p4050_p10 = scmp.ne.s32.totalorder %s22_s10, %s4049_s2  ;;  %p4055_p12 = scmp.lt.s32.totalorder %s4049_s2, %s4049_s2 }
  0x1c   :  { %p4056_p13 = por %p4055_p12, %p4054_p11 }
  0x1e   :  { %p4057_p0 = pnand %p4056_p13, %p4050_p10 }
  0x20   :  { %4060 = shalt.err (!%p4057_p0)
}
  0x21   :  { %27 = dma.hbm_to_vmem [thread:$0]  %s4265_s1, 35072, %s22_s10, [#allocation3], %s4109_s26, %s4109_s26, %s4110_s27  }
  0x22   :  { %s4069_s4 = scalar_lea.vmem %s46_s12, 4096  ;;  %p4074_p2 = scmp.lt.s32.totalorder %s46_s12, %s46_s12 }
  0x23   :  { %p4070_p1 = scmp.ne.s32.totalorder %s46_s12, %s4069_s4  ;;  %p4075_p3 = scmp.lt.s32.totalorder %s4069_s4, %s4069_s4 }
  0x25   :  { %p4076_p4 = por %p4075_p3, %p4074_p2 }
  0x27   :  { %p4077_p5 = pnand %p4076_p4, %p4070_p1 }
  0x29   :  { %4080 = shalt.err (!%p4077_p5)
}
  0x2a   :  { %51 = dma.hbm_to_vmem [thread:$0]  %s4267_s3, 4096, %s46_s12, [#allocation5], %s4109_s26, %s4109_s26, %s4110_s27  }
  0x2b   :  { %s4113_s17 = smov [#allocation9]  }
  0x2c   :  { %s70_s18 = sshll.u32 %s4113_s17, 4  ;;  %s71_s18 = int_to_ptr.vmem [resolvable:$true] %s70_s18 }
  0x2d   :  { %s4089_s19 = scalar_lea.vmem %s71_s18, 128  ;;  %p4094_p7 = scmp.lt.s32.totalorder %s71_s18, %s71_s18 }
  0x2e   :  { %p4090_p6 = scmp.ne.s32.totalorder %s71_s18, %s4089_s19  ;;  %p4095_p8 = scmp.lt.s32.totalorder %s4089_s19, %s4089_s19 }
  0x30   :  { %p4096_p9 = por %p4095_p8, %p4094_p7 }
  0x32   :  { %p4097_p10 = pnand %p4096_p9, %p4090_p6 }
  0x34   :  { %4100 = shalt.err (!%p4097_p10)
}
  0x35   :  { %73 = dma.hbm_to_vmem [thread:$0]  %s4269_s5, 128, %s71_s18, [#allocation8]  }
  0x36   :  { %4101 = dma.done.wait [#allocation3], 35072  }
  0x37   :  { %4102 = vsyncadd [#allocation3], 4294932224 }
  0x38   :  { %4103 = dma.done.wait [#allocation5], 8192  }
  0x39   :  { %4104 = vsyncadd [#allocation5], 4294959104 }
  0x3a   :  { %4105 = dma.done.wait [#allocation8], 4224  }
  0x3b   :  { %4106 = vsyncadd [#allocation8], 4294963072  ;;  %v3444_v0 = vld [vmem:[#allocation2 + $0x74] ss:$8 sps:$4 sm:$0xff]   ;;  %v3446_v1 = vld [vmem:[#allocation2 + $0x70] ss:$8 sps:$4 sm:$0xff]   ;;  %v369_v35 = vlaneseq }
  0x3c   :  { %1909 = vmatprep.subr.bf16.mxu0 %v3444_v0  ;;  %v3447_v2 = vld [vmem:[#allocation2 + $0x174] ss:$8 sps:$4 sm:$0xff]   ;;  %v3449_v3 = vld [vmem:[#allocation2 + $0x170] ss:$8 sps:$4 sm:$0xff]   ;;  %v3450_v4 = vld [vmem:[#allocation2 + $0x64] ss:$8 sps:$4 sm:$0xff]  }
  0x3d   :  { %1910 = vmatpush1.bf16.msra.mxu0 %v3446_v1  ;;  %v3452_v5 = vld [vmem:[#allocation2 + $0x60] ss:$8 sps:$4 sm:$0xff]   ;;  %1950 = vmatprep.subr.bf16.mxu1 %v3447_v2  ;;  %v3453_v6 = vld [vmem:[#allocation2 + $0x164] ss:$8 sps:$4 sm:$0xff]   ;;  %v3456_v8 = vld [vmem:[#allocation2 + $0x54] ss:$8 sps:$4 sm:$0xff]  }
  0x3e   :  { %1951 = vmatpush1.bf16.msra.mxu1 %v3449_v3  ;;  %1911 = vmatprep.subr.bf16.mxu0 %v3450_v4  ;;  %v3455_v7 = vld [vmem:[#allocation2 + $0x160] ss:$8 sps:$4 sm:$0xff]   ;;  %v3458_v9 = vld [vmem:[#allocation2 + $0x50] ss:$8 sps:$4 sm:$0xff]   ;;  %v3459_v10 = vld [vmem:[#allocation2 + $0x154] ss:$8 sps:$4 sm:$0xff]  }
  0x3f   :  { %1952 = vmatprep.subr.bf16.mxu1 %v3453_v6  ;;  %v3462_v11 = vld [vmem:[#allocation2 + $0x44] ss:$8 sps:$4 sm:$0xff]   ;;  %v3461_v12 = vld [vmem:[#allocation2 + $0x150] ss:$8 sps:$4 sm:$0xff]   ;;  %v3464_v14 = vld [vmem:[#allocation2 + $0x40] ss:$8 sps:$4 sm:$0xff]  }
  0x40   :  { %v3465_v13 = vld [vmem:[#allocation2 + $0x144] ss:$8 sps:$4 sm:$0xff]   ;;  %v3468_v15 = vld [vmem:[#allocation2 + $0x34] ss:$8 sps:$4 sm:$0xff]   ;;  %v3467_v16 = vld [vmem:[#allocation2 + $0x140] ss:$8 sps:$4 sm:$0xff]  }
  0x41   :  { %1912 = vmatpush1.bf16.msra.mxu0 %v3452_v5  ;;  %v3471_v17 = vld [vmem:[#allocation2 + $0x134] ss:$8 sps:$4 sm:$0xff]   ;;  %v3470_v18 = vld [vmem:[#allocation2 + $0x30] ss:$8 sps:$4 sm:$0xff]   ;;  %v3474_v19 = vld [vmem:[#allocation2 + $0x24] ss:$8 sps:$4 sm:$0xff]  }
  0x42   :  { %1913 = vmatprep.subr.bf16.mxu0 %v3456_v8  ;;  %1953 = vmatpush1.bf16.msra.mxu1 %v3455_v7  ;;  %v3473_v20 = vld [vmem:[#allocation2 + $0x130] ss:$8 sps:$4 sm:$0xff]   ;;  %v3477_v21 = vld [vmem:[#allocation2 + $0x124] ss:$8 sps:$4 sm:$0xff]   ;;  %v3476_v22 = vld [vmem:[#allocation2 + $0x20] ss:$8 sps:$4 sm:$0xff]  }
  0x43   :  { %1954 = vmatprep.subr.bf16.mxu1 %v3459_v10  ;;  %v3480_v23 = vld [vmem:[#allocation2 + $0x14] ss:$8 sps:$4 sm:$0xff]   ;;  %v3479_v24 = vld [vmem:[#allocation2 + $0x120] ss:$8 sps:$4 sm:$0xff]   ;;  %v3482_v26 = vld [vmem:[#allocation2 + $0x10] ss:$8 sps:$4 sm:$0xff]  }
  0x44   :  { %v3483_v25 = vld [vmem:[#allocation2 + $0x114] ss:$8 sps:$4 sm:$0xff]   ;;  %v3486_v27 = vld [vmem:[#allocation2 + $0x4] ss:$8 sps:$4 sm:$0xff]   ;;  %v3485_v28 = vld [vmem:[#allocation2 + $0x110] ss:$8 sps:$4 sm:$0xff]  }
  0x45   :  { %1914 = vmatpush1.bf16.msra.mxu0 %v3458_v9  ;;  %v3489_v29 = vld [vmem:[#allocation2 + $0x104] ss:$8 sps:$4 sm:$0xff]   ;;  %v3488_v30 = vld [vmem:[#allocation2] ss:$8 sps:$4 sm:$0xff]   ;;  %v3492_v31 = vld [vmem:[#allocation2 + $0xf4] ss:$8 sps:$4 sm:$0xff]  }
  0x46   :  { %1915 = vmatprep.subr.bf16.mxu0 %v3462_v11  ;;  %1955 = vmatpush1.bf16.msra.mxu1 %v3461_v12  ;;  %v3491_v32 = vld [vmem:[#allocation2 + $0x100] ss:$8 sps:$4 sm:$0xff]   ;;  %v3495_v33 = vld [vmem:[#allocation2 + $0x1f4] ss:$8 sps:$4 sm:$0xff]   ;;  %v3494_v34 = vld [vmem:[#allocation2 + $0xf0] ss:$8 sps:$4 sm:$0xff]  }
  0x47   :  { %1956 = vmatprep.subr.bf16.mxu1 %v3465_v13  ;;  %v4114_v36 = vmov 1966171168   ;;  %v3498_v38 = vld [vmem:[#allocation2 + $0xe4] ss:$8 sps:$4 sm:$0xff]   ;;  %v3497_v39 = vld [vmem:[#allocation2 + $0x1f0] ss:$8 sps:$4 sm:$0xff]  }
  0x48   :  { %v392_v37 = vunpack.c.l.s4 %v4114_v36  ;;  %v3501_v40 = vld [vmem:[#allocation2 + $0x1e4] ss:$8 sps:$4 sm:$0xff]   ;;  %v3500_v41 = vld [vmem:[#allocation2 + $0xe0] ss:$8 sps:$4 sm:$0xff]   ;;  %v4178_v42 = vshrl.u32 %v369_v35, 7  ;;  %vm1895_vm0 = vcmask 89088  }
  0x49   :  { %1916 = vmatpush1.bf16.msra.mxu0 %v3464_v14  ;;  %v3504_v44 = vld [vmem:[#allocation2 + $0xd4] ss:$8 sps:$4 sm:$0xff]   ;;  %v3503_v45 = vld [vmem:[#allocation2 + $0x1e0] ss:$8 sps:$4 sm:$0xff]   ;;  %v3506_v47 = vld [vmem:[#allocation2 + $0xd0] ss:$8 sps:$4 sm:$0xff]  }
  0x4a   :  { %1917 = vmatprep.subr.bf16.mxu0 %v3468_v15  ;;  %1957 = vmatpush1.bf16.msra.mxu1 %v3467_v16  ;;  %v393_v43 = vunpack.c.0.s8 %v392_v37  ;;  %v3507_v46 = vld [vmem:[#allocation2 + $0x1d4] ss:$8 sps:$4 sm:$0xff]   ;;  %v3510_v49 = vld [vmem:[#allocation2 + $0xc4] ss:$8 sps:$4 sm:$0xff]   ;;  %v3509_v50 = vld [vmem:[#allocation2 + $0x1d0] ss:$8 sps:$4 sm:$0xff]  }
  0x4b   :  { %1958 = vmatprep.subr.bf16.mxu1 %v3471_v17  ;;  %v3513_v51 = vld [vmem:[#allocation2 + $0x1c4] ss:$8 sps:$4 sm:$0xff]   ;;  %v3512_v53 = vld [vmem:[#allocation2 + $0xc0] ss:$8 sps:$4 sm:$0xff]   ;;  %v3516_v55 = vld [vmem:[#allocation2 + $0xb4] ss:$8 sps:$4 sm:$0xff]  }
  0x4c   :  { %v4181_v48 = vsub.s32 %v393_v43, %v4178_v42  ;;  %v91_v52 = vld [vmem:[%s4264_s0] sm:$0xff]  ;;  %v3519_v58 = vld [vmem:[#allocation2 + $0x1b4] ss:$8 sps:$4 sm:$0xff]   ;;  %v3518_v59 = vld [vmem:[#allocation2 + $0xb0] ss:$8 sps:$4 sm:$0xff]   ;;  %vm1899_vm1 = vcmask 1044480  }
  0x4d   :  { %1918 = vmatpush1.bf16.msra.mxu0 %v3470_v18  ;;  %v3515_v56 = vld [vmem:[#allocation2 + $0x1c0] ss:$8 sps:$4 sm:$0xff]   ;;  %v3522_v61 = vld [vmem:[#allocation2 + $0xa4] ss:$8 sps:$4 sm:$0xff]   ;;  %v3521_v62 = vld [vmem:[#allocation2 + $0x1b0] ss:$8 sps:$4 sm:$0xff]   ;;  %v390_v63 = vcombine.high %v91_v52, %v91_v52 }
  0x4e   :  { %1919 = vmatprep.subr.bf16.mxu0 %v3474_v19  ;;  %1959 = vmatpush1.bf16.msra.mxu1 %v3473_v20  ;;  %v397_v54 = vrot.slane %v91_v52, %v4181_v48  ;;  %v3525_v1 = vld [vmem:[#allocation2 + $0x1a4] ss:$8 sps:$4 sm:$0xff]   ;;  %v3524_v2 = vld [vmem:[#allocation2 + $0xa0] ss:$8 sps:$4 sm:$0xff]   ;;  %v3528_v3 = vld [vmem:[#allocation2 + $0x94] ss:$8 sps:$4 sm:$0xff]  }
  0x4f   :  { %1960 = vmatprep.subr.bf16.mxu1 %v3477_v21  ;;  %v3527_v4 = vld [vmem:[#allocation2 + $0x1a0] ss:$8 sps:$4 sm:$0xff]   ;;  %v4189_v5 = vrot.slane %v390_v63, %v4181_v48  ;;  %v3531_v6 = vld [vmem:[#allocation2 + $0x194] ss:$8 sps:$4 sm:$0xff]   ;;  %v3530_v7 = vld [vmem:[#allocation2 + $0x90] ss:$8 sps:$4 sm:$0xff]  }
  0x50   :  { %v405_v57 = vcombine.high %v397_v54, %v397_v54  ;;  %v3534_v8 = vld [vmem:[#allocation2 + $0x84] ss:$8 sps:$4 sm:$0xff]   ;;  %v3533_v9 = vld [vmem:[#allocation2 + $0x190] ss:$8 sps:$4 sm:$0xff]   ;;  %v3536_v12 = vld [vmem:[#allocation2 + $0x80] ss:$8 sps:$4 sm:$0xff]   ;;  %v413_v13 = vrot.slane %v397_v54, %v4181_v48 }
  0x51   :  { %1920 = vmatpush1.bf16.msra.mxu0 %v3476_v22  ;;  %v406_v10 = vcombine.high %v4189_v5, %v4189_v5  ;;  %v3537_v11 = vld [vmem:[#allocation2 + $0x184] ss:$8 sps:$4 sm:$0xff]   ;;  %v3543_v14 = vld [vmem:[#allocation2 + $0x274] ss:$8 sps:$4 sm:$0xff]   ;;  %v3540_v15 = vld [vmem:[#allocation2 + $0x180] ss:$8 sps:$4 sm:$0xff]  }
  0x52   :  { %1921 = vmatprep.subr.bf16.mxu0 %v3480_v23  ;;  %1961 = vmatpush1.bf16.msra.mxu1 %v3479_v24  ;;  %v427_v60 = vrot.slane %v405_v57, %v4181_v48  ;;  %v3546_v17 = vld [vmem:[#allocation2 + $0x374] ss:$8 sps:$4 sm:$0xff]   ;;  %v3541_v18 = vld [vmem:[#allocation2 + $0x270] ss:$8 sps:$4 sm:$0xff]   ;;  %v435_v19 = vcombine.high %v413_v13, %v413_v13  ;;  %v3549_v20 = vld [vmem:[#allocation2 + $0x264] ss:$8 sps:$4 sm:$0xff]  }
  0x53   :  { %1962 = vmatprep.subr.bf16.mxu1 %v3483_v25  ;;  %v434_v16 = vrot.slane %v406_v10, %v4181_v48  ;;  %v3544_v21 = vld [vmem:[#allocation2 + $0x370] ss:$8 sps:$4 sm:$0xff]   ;;  %v3552_v23 = vld [vmem:[#allocation2 + $0x364] ss:$8 sps:$4 sm:$0xff]   ;;  %v3547_v24 = vld [vmem:[#allocation2 + $0x260] ss:$8 sps:$4 sm:$0xff]  }
  0x54   :  { %1941 = vmatprep.mubr.bf16.mxu0 %v427_v60  ;;  %v437_v0 = vcombine.high %v427_v60, %v427_v60  ;;  %v3555_v25 = vld [vmem:[#allocation2 + $0x254] ss:$8 sps:$4 sm:$0xff]   ;;  %v3565_v36 = vld [vmem:[#allocation2 + $0x230] ss:$8 sps:$4 sm:$0xff]   ;;  %v3573_v37 = vld [vmem:[#allocation2 + $0x224] ss:$8 sps:$4 sm:$0xff]  }
  0x55   :  { %1922 = vmatpush1.bf16.msra.mxu0 %v3482_v26  ;;  %v438_v22 = vcombine.high %v434_v16, %v434_v16  ;;  %v3550_v26 = vld [vmem:[#allocation2 + $0x360] ss:$8 sps:$4 sm:$0xff]   ;;  %v3570_v35 = vld [vmem:[#allocation2 + $0x334] ss:$8 sps:$4 sm:$0xff]   ;;  %v3589_v54 = vld [vmem:[#allocation2 + $0x2f0] ss:$8 sps:$4 sm:$0xff]  }
  0x56   :  { %1923 = vmatprep.subr.bf16.mxu0 %v3486_v27  ;;  %1963 = vmatpush1.bf16.msra.mxu1 %v3485_v28  ;;  %v3558_v27 = vld [vmem:[#allocation2 + $0x354] ss:$8 sps:$4 sm:$0xff]   ;;  %v3553_v28 = vld [vmem:[#allocation2 + $0x250] ss:$8 sps:$4 sm:$0xff]   ;;  %v3574_v43 = vld [vmem:[#allocation2 + $0x320] ss:$8 sps:$4 sm:$0xff]  }
  0x57   :  { %1964 = vmatprep.subr.bf16.mxu1 %v3489_v29  ;;  %1982 = vmatprep.mubr.bf16.mxu1 %v437_v0  ;;  %v3561_v29 = vld [vmem:[#allocation2 + $0x244] ss:$8 sps:$4 sm:$0xff]   ;;  %v3586_v52 = vld [vmem:[#allocation2 + $0x300] ss:$8 sps:$4 sm:$0xff]   ;;  %v3604_v0 = vld [vmem:[#allocation2 + $0x3d0] ss:$8 sps:$4 sm:$0xff]  }
  0x58   :  { %v3600_v57 = vld [vmem:[#allocation2 + $0x3e4] ss:$8 sps:$4 sm:$0xff]   ;;  %v3598_v60 = vld [vmem:[#allocation2 + $0x3e0] ss:$8 sps:$4 sm:$0xff]   ;;  %vm1900_vm2 = vcmask 1045504  }
  0x59   :  { %1924 = vmatpush1.bf16.msra.mxu0 %v3488_v30  ;;  %v3556_v30 = vld [vmem:[#allocation2 + $0x350] ss:$8 sps:$4 sm:$0xff]   ;;  %v3609_v63 = vld [vmem:[#allocation2 + $0x2c4] ss:$8 sps:$4 sm:$0xff]  }
  0x5a   :  { %1925 = vmatprep.subr.bf16.mxu0 %v3492_v31  ;;  %1965 = vmatpush1.bf16.msra.mxu1 %v3491_v32  ;;  %v3564_v31 = vld [vmem:[#allocation2 + $0x344] ss:$8 sps:$4 sm:$0xff]   ;;  %v3559_v32 = vld [vmem:[#allocation2 + $0x240] ss:$8 sps:$4 sm:$0xff]  }
  0x5b   :  { %1966 = vmatprep.subr.bf16.mxu1 %v3495_v33  ;;  %v3567_v33 = vld [vmem:[#allocation2 + $0x234] ss:$8 sps:$4 sm:$0xff]   ;;  %v3624_v10 = vld [vmem:[#allocation2 + $0x3a4] ss:$8 sps:$4 sm:$0xff]  }
  0x5d   :  { %1926 = vmatpush2.bf16.msra.mxu0 %v3494_v34  ;;  %v3562_v34 = vld [vmem:[#allocation2 + $0x340] ss:$8 sps:$4 sm:$0xff]  }
  0x5e   :  { %1927 = vmatprep.subr.bf16.mxu0 %v3498_v38  ;;  %1967 = vmatpush2.bf16.msra.mxu1 %v3497_v39  ;;  %v3568_v38 = vld [vmem:[#allocation2 + $0x330] ss:$8 sps:$4 sm:$0xff]   ;;  %v3576_v39 = vld [vmem:[#allocation2 + $0x324] ss:$8 sps:$4 sm:$0xff]  }
  0x5f   :  { %1968 = vmatprep.subr.bf16.mxu1 %v3501_v40  ;;  %v3571_v40 = vld [vmem:[#allocation2 + $0x220] ss:$8 sps:$4 sm:$0xff]  }
  0x61   :  { %1928 = vmatpush2.bf16.msra.mxu0 %v3500_v41  ;;  %v3579_v41 = vld [vmem:[#allocation2 + $0x214] ss:$8 sps:$4 sm:$0xff]  }
  0x62   :  { %1929 = vmatprep.subr.bf16.mxu0 %v3504_v44  ;;  %1969 = vmatpush2.bf16.msra.mxu1 %v3503_v45  ;;  %v3582_v44 = vld [vmem:[#allocation2 + $0x314] ss:$8 sps:$4 sm:$0xff]   ;;  %v3577_v45 = vld [vmem:[#allocation2 + $0x210] ss:$8 sps:$4 sm:$0xff]  }
  0x63   :  { %1970 = vmatprep.subr.bf16.mxu1 %v3507_v46  ;;  %v3585_v46 = vld [vmem:[#allocation2 + $0x204] ss:$8 sps:$4 sm:$0xff]  }
  0x65   :  { %1930 = vmatpush2.bf16.msra.mxu0 %v3506_v47  ;;  %v3580_v47 = vld [vmem:[#allocation2 + $0x310] ss:$8 sps:$4 sm:$0xff]  }
  0x66   :  { %1931 = vmatprep.subr.bf16.mxu0 %v3510_v49  ;;  %1971 = vmatpush2.bf16.msra.mxu1 %v3509_v50  ;;  %v3588_v49 = vld [vmem:[#allocation2 + $0x304] ss:$8 sps:$4 sm:$0xff]   ;;  %v3583_v50 = vld [vmem:[#allocation2 + $0x200] ss:$8 sps:$4 sm:$0xff]  }
  0x67   :  { %1972 = vmatprep.subr.bf16.mxu1 %v3513_v51  ;;  %v3591_v51 = vld [vmem:[#allocation2 + $0x2f4] ss:$8 sps:$4 sm:$0xff]  }
  0x69   :  { %1932 = vmatpush2.bf16.msra.mxu0 %v3512_v53  ;;  %v3594_v53 = vld [vmem:[#allocation2 + $0x3f4] ss:$8 sps:$4 sm:$0xff]  }
  0x6a   :  { %1933 = vmatprep.subr.bf16.mxu0 %v3516_v55  ;;  %1973 = vmatpush2.bf16.msra.mxu1 %v3515_v56  ;;  %v3597_v55 = vld [vmem:[#allocation2 + $0x2e4] ss:$8 sps:$4 sm:$0xff]   ;;  %v3592_v56 = vld [vmem:[#allocation2 + $0x3f0] ss:$8 sps:$4 sm:$0xff]  }
  0x6b   :  { %1974 = vmatprep.subr.bf16.mxu1 %v3519_v58  ;;  %v3595_v58 = vld [vmem:[#allocation2 + $0x2e0] ss:$8 sps:$4 sm:$0xff]  }
  0x6d   :  { %1934 = vmatpush2.bf16.msra.mxu0 %v3518_v59  ;;  %v3603_v59 = vld [vmem:[#allocation2 + $0x2d4] ss:$8 sps:$4 sm:$0xff]  }
  0x6e   :  { %1935 = vmatprep.subr.bf16.mxu0 %v3522_v61  ;;  %1975 = vmatpush2.bf16.msra.mxu1 %v3521_v62  ;;  %v3606_v61 = vld [vmem:[#allocation2 + $0x3d4] ss:$8 sps:$4 sm:$0xff]   ;;  %v3601_v62 = vld [vmem:[#allocation2 + $0x2d0] ss:$8 sps:$4 sm:$0xff]  }
  0x6f   :  { %1976 = vmatprep.subr.bf16.mxu1 %v3525_v1  ;;  %v3612_v1 = vld [vmem:[#allocation2 + $0x3c4] ss:$8 sps:$4 sm:$0xff]  }
  0x71   :  { %1936 = vmatpush2.bf16.msra.mxu0 %v3524_v2  ;;  %v3607_v2 = vld [vmem:[#allocation2 + $0x2c0] ss:$8 sps:$4 sm:$0xff]  }
  0x72   :  { %1937 = vmatprep.subr.bf16.mxu0 %v3528_v3  ;;  %1977 = vmatpush2.bf16.msra.mxu1 %v3527_v4  ;;  %v3615_v3 = vld [vmem:[#allocation2 + $0x2b4] ss:$8 sps:$4 sm:$0xff]   ;;  %v3610_v4 = vld [vmem:[#allocation2 + $0x3c0] ss:$8 sps:$4 sm:$0xff]  }
  0x73   :  { %1978 = vmatprep.subr.bf16.mxu1 %v3531_v6  ;;  %v3618_v6 = vld [vmem:[#allocation2 + $0x3b4] ss:$8 sps:$4 sm:$0xff]  }
  0x75   :  { %1938 = vmatpush2.bf16.msra.mxu0 %v3530_v7  ;;  %v3613_v7 = vld [vmem:[#allocation2 + $0x2b0] ss:$8 sps:$4 sm:$0xff]  }
  0x76   :  { %1939 = vmatprep.subr.bf16.mxu0 %v3534_v8  ;;  %1979 = vmatpush2.bf16.msra.mxu1 %v3533_v9  ;;  %v3621_v8 = vld [vmem:[#allocation2 + $0x2a4] ss:$8 sps:$4 sm:$0xff]   ;;  %v3616_v9 = vld [vmem:[#allocation2 + $0x3b0] ss:$8 sps:$4 sm:$0xff]  }
  0x77   :  { %1980 = vmatprep.subr.bf16.mxu1 %v3537_v11  ;;  %v3619_v11 = vld [vmem:[#allocation2 + $0x2a0] ss:$8 sps:$4 sm:$0xff]  }
  0x79   :  { %1940 = vmatpush2.bf16.msra.mxu0 %v3536_v12  ;;  %v3627_v12 = vld [vmem:[#allocation2 + $0x294] ss:$8 sps:$4 sm:$0xff]  }
  0x7a   :  { %1991 = vmatprep.subr.bf16.mxu0 %v3543_v14  ;;  %1981 = vmatpush2.bf16.msra.mxu1 %v3540_v15  ;;  %v3630_v14 = vld [vmem:[#allocation2 + $0x394] ss:$8 sps:$4 sm:$0xff]   ;;  %v3625_v15 = vld [vmem:[#allocation2 + $0x290] ss:$8 sps:$4 sm:$0xff]  }
  0x7b   :  { %2032 = vmatprep.subr.bf16.mxu1 %v3546_v17  ;;  %v3628_v17 = vld [vmem:[#allocation2 + $0x390] ss:$8 sps:$4 sm:$0xff]  }
  0x7c   :  { %1942 = vmatmul.mubr.bf16.vlgmr.msra.gmra.mxu0 %v413_v13  ;;  %v3622_v13 = vld [vmem:[#allocation2 + $0x3a0] ss:$8 sps:$4 sm:$0xff]  }
  0x7d   :  { %1992 = vmatpush1.bf16.msra.mxu0 %v3541_v18  ;;  %2023 = vmatprep.mubr.bf16.mxu0 %v434_v16  ;;  %v3633_v16 = vld [vmem:[#allocation2 + $0x284] ss:$8 sps:$4 sm:$0xff]  }
  0x7e   :  { %1983 = vmatmul.mubr.bf16.vlgmr.msra.gmra.mxu1 %v435_v19  ;;  %1993 = vmatprep.subr.bf16.mxu0 %v3549_v20  ;;  %v3636_v18 = vld [vmem:[#allocation2 + $0x384] ss:$8 sps:$4 sm:$0xff]   ;;  %v3631_v19 = vld [vmem:[#allocation2 + $0x280] ss:$8 sps:$4 sm:$0xff]   ;;  %v420_v20 = vrot.slane %v4189_v5, %v4181_v48 }
  0x7f   :  { %2033 = vmatpush1.bf16.msra.mxu1 %v3544_v21  ;;  %2064 = vmatprep.mubr.bf16.mxu1 %v438_v22  ;;  %v3639_v21 = vld [vmem:[#allocation2 + $0x474] ss:$8 sps:$4 sm:$0xff]   ;;  %v3634_v22 = vld [vmem:[#allocation2 + $0x380] ss:$8 sps:$4 sm:$0xff]  }
  0x80   :  { %2034 = vmatprep.subr.bf16.mxu1 %v3552_v23  ;;  %v3642_v23 = vld [vmem:[#allocation2 + $0x574] ss:$8 sps:$4 sm:$0xff]  }
  0x81   :  { %1994 = vmatpush1.bf16.msra.mxu0 %v3547_v24  ;;  %v3637_v24 = vld [vmem:[#allocation2 + $0x470] ss:$8 sps:$4 sm:$0xff]  }
  0x82   :  { %1995 = vmatprep.subr.bf16.mxu0 %v3555_v25  ;;  %v436_v25 = vcombine.high %v420_v20, %v420_v20 }
  0x83   :  { %2035 = vmatpush1.bf16.msra.mxu1 %v3550_v26  ;;  %v3645_v26 = vld [vmem:[#allocation2 + $0x464] ss:$8 sps:$4 sm:$0xff]  }
  0x84   :  { %2036 = vmatprep.subr.bf16.mxu1 %v3558_v27  ;;  %v4200_v27 = vld [vmem:[%s4264_s0 + $0x8] sm:$0xff] }
  0x85   :  { %1996 = vmatpush1.bf16.msra.mxu0 %v3553_v28  ;;  %v3640_v28 = vld [vmem:[#allocation2 + $0x570] ss:$8 sps:$4 sm:$0xff]   ;;  %v4204_v5 = vrot.slane %v4200_v27, %v4181_v48 }
  0x86   :  { %1997 = vmatprep.subr.bf16.mxu0 %v3561_v29  ;;  %v3648_v29 = vld [vmem:[#allocation2 + $0x564] ss:$8 sps:$4 sm:$0xff]  }
  0x87   :  { %2037 = vmatpush1.bf16.msra.mxu1 %v3556_v30  ;;  %v3643_v30 = vld [vmem:[#allocation2 + $0x460] ss:$8 sps:$4 sm:$0xff]  }
  0x88   :  { %2038 = vmatprep.subr.bf16.mxu1 %v3564_v31  ;;  %v454_v31 = vcombine.high %v4204_v5, %v4204_v5 }
  0x89   :  { %1998 = vmatpush1.bf16.msra.mxu0 %v3559_v32  ;;  %v3651_v32 = vld [vmem:[#allocation2 + $0x454] ss:$8 sps:$4 sm:$0xff]  }
  0x8a   :  { %1999 = vmatprep.subr.bf16.mxu0 %v3567_v33  ;;  %v3646_v33 = vld [vmem:[#allocation2 + $0x560] ss:$8 sps:$4 sm:$0xff]  }
  0x8b   :  { %2039 = vmatpush1.bf16.msra.mxu1 %v3562_v34  ;;  %v476_v34 = vrot.slane %v454_v31, %v4181_v48 }
  0x8c   :  { %2040 = vmatprep.subr.bf16.mxu1 %v3570_v35  ;;  %v3654_v35 = vld [vmem:[#allocation2 + $0x554] ss:$8 sps:$4 sm:$0xff]  }
  0x8d   :  { %2000 = vmatpush1.bf16.msra.mxu0 %v3565_v36  ;;  %v3649_v36 = vld [vmem:[#allocation2 + $0x450] ss:$8 sps:$4 sm:$0xff]  }
  0x8e   :  { %2001 = vmatprep.subr.bf16.mxu0 %v3573_v37  ;;  %v486_v37 = vcombine.high %v476_v34, %v476_v34 }
  0x8f   :  { %2041 = vmatpush1.bf16.msra.mxu1 %v3568_v38  ;;  %v3657_v38 = vld [vmem:[#allocation2 + $0x444] ss:$8 sps:$4 sm:$0xff]  }
  0x90   :  { %2042 = vmatprep.subr.bf16.mxu1 %v3576_v39  ;;  %v3652_v39 = vld [vmem:[#allocation2 + $0x550] ss:$8 sps:$4 sm:$0xff]  }
  0x91   :  { %2002 = vmatpush1.bf16.msra.mxu0 %v3571_v40  ;;  %v3660_v40 = vld [vmem:[#allocation2 + $0x544] ss:$8 sps:$4 sm:$0xff]  }
  0x92   :  { %2003 = vmatprep.subr.bf16.mxu0 %v3579_v41  ;;  %v3655_v41 = vld [vmem:[#allocation2 + $0x440] ss:$8 sps:$4 sm:$0xff]  }
  0x93   :  { %2043 = vmatpush1.bf16.msra.mxu1 %v3574_v43  ;;  %v3663_v43 = vld [vmem:[#allocation2 + $0x434] ss:$8 sps:$4 sm:$0xff]  }
  0x94   :  { %2044 = vmatprep.subr.bf16.mxu1 %v3582_v44  ;;  %v3658_v44 = vld [vmem:[#allocation2 + $0x540] ss:$8 sps:$4 sm:$0xff]  }
  0x95   :  { %2004 = vmatpush1.bf16.msra.mxu0 %v3577_v45  ;;  %v3666_v45 = vld [vmem:[#allocation2 + $0x534] ss:$8 sps:$4 sm:$0xff]  }
  0x96   :  { %2005 = vmatprep.subr.bf16.mxu0 %v3585_v46  ;;  %v3661_v46 = vld [vmem:[#allocation2 + $0x430] ss:$8 sps:$4 sm:$0xff]  }
  0x97   :  { %2045 = vmatpush1.bf16.msra.mxu1 %v3580_v47  ;;  %v3669_v47 = vld [vmem:[#allocation2 + $0x424] ss:$8 sps:$4 sm:$0xff]  }
  0x98   :  { %2046 = vmatprep.subr.bf16.mxu1 %v3588_v49  ;;  %v3664_v49 = vld [vmem:[#allocation2 + $0x530] ss:$8 sps:$4 sm:$0xff]  }
  0x99   :  { %2006 = vmatpush1.bf16.msra.mxu0 %v3583_v50  ;;  %v3672_v50 = vld [vmem:[#allocation2 + $0x524] ss:$8 sps:$4 sm:$0xff]  }
  0x9a   :  { %2007 = vmatprep.subr.bf16.mxu0 %v3591_v51  ;;  %v3667_v51 = vld [vmem:[#allocation2 + $0x420] ss:$8 sps:$4 sm:$0xff]  }
  0x9b   :  { %2047 = vmatpush1.bf16.msra.mxu1 %v3586_v52  ;;  %v3675_v52 = vld [vmem:[#allocation2 + $0x414] ss:$8 sps:$4 sm:$0xff]  }
  0x9c   :  { %2048 = vmatprep.subr.bf16.mxu1 %v3594_v53  ;;  %v3670_v53 = vld [vmem:[#allocation2 + $0x520] ss:$8 sps:$4 sm:$0xff]  }
  0x9d   :  { %2008 = vmatpush2.bf16.msra.mxu0 %v3589_v54  ;;  %v3678_v54 = vld [vmem:[#allocation2 + $0x514] ss:$8 sps:$4 sm:$0xff]  }
  0x9e   :  { %2009 = vmatprep.subr.bf16.mxu0 %v3597_v55  ;;  %v3673_v55 = vld [vmem:[#allocation2 + $0x410] ss:$8 sps:$4 sm:$0xff]  }
  0x9f   :  { %2049 = vmatpush2.bf16.msra.mxu1 %v3592_v56  ;;  %v3681_v56 = vld [vmem:[#allocation2 + $0x404] ss:$8 sps:$4 sm:$0xff]  }
  0xa0   :  { %2050 = vmatprep.subr.bf16.mxu1 %v3600_v57  ;;  %v3676_v57 = vld [vmem:[#allocation2 + $0x510] ss:$8 sps:$4 sm:$0xff]  }
  0xa1   :  { %2010 = vmatpush2.bf16.msra.mxu0 %v3595_v58  ;;  %v3684_v58 = vld [vmem:[#allocation2 + $0x504] ss:$8 sps:$4 sm:$0xff]  }
  0xa2   :  { %2011 = vmatprep.subr.bf16.mxu0 %v3603_v59  ;;  %v3679_v59 = vld [vmem:[#allocation2 + $0x400] ss:$8 sps:$4 sm:$0xff]  }
  0xa3   :  { %2051 = vmatpush2.bf16.msra.mxu1 %v3598_v60  ;;  %v3687_v60 = vld [vmem:[#allocation2 + $0x4f4] ss:$8 sps:$4 sm:$0xff]  }
  0xa4   :  { %2052 = vmatprep.subr.bf16.mxu1 %v3606_v61  ;;  %v3682_v61 = vld [vmem:[#allocation2 + $0x500] ss:$8 sps:$4 sm:$0xff]  }
  0xa5   :  { %2012 = vmatpush2.bf16.msra.mxu0 %v3601_v62  ;;  %v3690_v62 = vld [vmem:[#allocation2 + $0x5f4] ss:$8 sps:$4 sm:$0xff]  }
  0xa6   :  { %2013 = vmatprep.subr.bf16.mxu0 %v3609_v63  ;;  %v3685_v63 = vld [vmem:[#allocation2 + $0x4f0] ss:$8 sps:$4 sm:$0xff]  }
  0xa7   :  { %2053 = vmatpush2.bf16.msra.mxu1 %v3604_v0  ;;  %v3693_v0 = vld [vmem:[#allocation2 + $0x4e4] ss:$8 sps:$4 sm:$0xff]  }
  0xa8   :  { %2054 = vmatprep.subr.bf16.mxu1 %v3612_v1  ;;  %v3688_v1 = vld [vmem:[#allocation2 + $0x5f0] ss:$8 sps:$4 sm:$0xff]  }
  0xa9   :  { %2014 = vmatpush2.bf16.msra.mxu0 %v3607_v2  ;;  %v3696_v2 = vld [vmem:[#allocation2 + $0x5e4] ss:$8 sps:$4 sm:$0xff]  }
  0xaa   :  { %2015 = vmatprep.subr.bf16.mxu0 %v3615_v3  ;;  %v3691_v3 = vld [vmem:[#allocation2 + $0x4e0] ss:$8 sps:$4 sm:$0xff]  }
  0xab   :  { %2055 = vmatpush2.bf16.msra.mxu1 %v3610_v4  ;;  %v3699_v4 = vld [vmem:[#allocation2 + $0x4d4] ss:$8 sps:$4 sm:$0xff]  }
  0xac   :  { %2056 = vmatprep.subr.bf16.mxu1 %v3618_v6  ;;  %v3694_v6 = vld [vmem:[#allocation2 + $0x5e0] ss:$8 sps:$4 sm:$0xff]  }
  0xad   :  { %2016 = vmatpush2.bf16.msra.mxu0 %v3613_v7  ;;  %v3702_v7 = vld [vmem:[#allocation2 + $0x5d4] ss:$8 sps:$4 sm:$0xff]  }
  0xae   :  { %2017 = vmatprep.subr.bf16.mxu0 %v3621_v8  ;;  %v3697_v8 = vld [vmem:[#allocation2 + $0x4d0] ss:$8 sps:$4 sm:$0xff]  }
  0xaf   :  { %2057 = vmatpush2.bf16.msra.mxu1 %v3616_v9  ;;  %v3705_v9 = vld [vmem:[#allocation2 + $0x4c4] ss:$8 sps:$4 sm:$0xff]  }
  0xb0   :  { %2058 = vmatprep.subr.bf16.mxu1 %v3624_v10  ;;  %v3700_v10 = vld [vmem:[#allocation2 + $0x5d0] ss:$8 sps:$4 sm:$0xff]  }
  0xb1   :  { %2018 = vmatpush2.bf16.msra.mxu0 %v3619_v11  ;;  %v3708_v11 = vld [vmem:[#allocation2 + $0x5c4] ss:$8 sps:$4 sm:$0xff]  }
  0xb2   :  { %2019 = vmatprep.subr.bf16.mxu0 %v3627_v12  ;;  %v3703_v12 = vld [vmem:[#allocation2 + $0x4c0] ss:$8 sps:$4 sm:$0xff]  }
  0xb3   :  { %2059 = vmatpush2.bf16.msra.mxu1 %v3622_v13  ;;  %v3711_v13 = vld [vmem:[#allocation2 + $0x4b4] ss:$8 sps:$4 sm:$0xff]  }
  0xb4   :  { %2060 = vmatprep.subr.bf16.mxu1 %v3630_v14  ;;  %v3706_v14 = vld [vmem:[#allocation2 + $0x5c0] ss:$8 sps:$4 sm:$0xff]  }
  0xb5   :  { %2020 = vmatpush2.bf16.msra.mxu0 %v3625_v15  ;;  %v3714_v15 = vld [vmem:[#allocation2 + $0x5b4] ss:$8 sps:$4 sm:$0xff]  }
  0xb6   :  { %2021 = vmatprep.subr.bf16.mxu0 %v3633_v16  ;;  %v3709_v16 = vld [vmem:[#allocation2 + $0x4b0] ss:$8 sps:$4 sm:$0xff]  }
  0xb7   :  { %2061 = vmatpush2.bf16.msra.mxu1 %v3628_v17  ;;  %v3717_v17 = vld [vmem:[#allocation2 + $0x4a4] ss:$8 sps:$4 sm:$0xff]  }
  0xb8   :  { %2062 = vmatprep.subr.bf16.mxu1 %v3636_v18  ;;  %v3712_v18 = vld [vmem:[#allocation2 + $0x5b0] ss:$8 sps:$4 sm:$0xff]  }
  0xb9   :  { %2022 = vmatpush2.bf16.msra.mxu0 %v3631_v19  ;;  %v439_v19 = vcombine.high %v4200_v27, %v4200_v27  ;;  %v3727_v27 = vld [vmem:[#allocation2 + $0x480] ss:$8 sps:$4 sm:$0xff]  }
  0xba   :  { %2073 = vmatprep.subr.bf16.mxu0 %v3639_v21  ;;  %v3715_v21 = vld [vmem:[#allocation2 + $0x4a0] ss:$8 sps:$4 sm:$0xff]  }
  0xbb   :  { %2063 = vmatpush2.bf16.msra.mxu1 %v3634_v22  ;;  %v3723_v22 = vld [vmem:[#allocation2 + $0x494] ss:$8 sps:$4 sm:$0xff]  }
  0xbc   :  { %2024 = vmatmul.mubr.bf16.vlgmr.msra.gmra.mxu0 %v420_v20  ;;  %2114 = vmatprep.subr.bf16.mxu1 %v3642_v23  ;;  %v3720_v20 = vld [vmem:[#allocation2 + $0x5a4] ss:$8 sps:$4 sm:$0xff]   ;;  %v3718_v23 = vld [vmem:[#allocation2 + $0x5a0] ss:$8 sps:$4 sm:$0xff]  }
  0xbd   :  { %2074 = vmatpush1.bf16.msra.mxu0 %v3637_v24  ;;  %2105 = vmatprep.mubr.bf16.mxu0 %v476_v34  ;;  %v4212_v24 = vrot.slane %v439_v19, %v4181_v48  ;;  %v462_v34 = vrot.slane %v4204_v5, %v4181_v48  ;;  %v3742_v5 = vld [vmem:[#allocation2 + $0x760] ss:$8 sps:$4 sm:$0xff]   ;;  %v3796_v19 = vld [vmem:[#allocation2 + $0x7d0] ss:$8 sps:$4 sm:$0xff]  }
  0xbe   :  { %2065 = vmatmul.mubr.bf16.vlgmr.msra.gmra.mxu1 %v436_v25  ;;  %2075 = vmatprep.subr.bf16.mxu0 %v3645_v26  ;;  %v3726_v25 = vld [vmem:[#allocation2 + $0x594] ss:$8 sps:$4 sm:$0xff]   ;;  %v3721_v26 = vld [vmem:[#allocation2 + $0x490] ss:$8 sps:$4 sm:$0xff]  }
  0xbf   :  { %2115 = vmatpush1.bf16.msra.mxu1 %v3640_v28  ;;  %2146 = vmatprep.mubr.bf16.mxu1 %v486_v37  ;;  %v3724_v28 = vld [vmem:[#allocation2 + $0x590] ss:$8 sps:$4 sm:$0xff]   ;;  %v455_v31 = vcombine.high %v4212_v24, %v4212_v24 }
  0xc0   :  { %2116 = vmatprep.subr.bf16.mxu1 %v3648_v29  ;;  %v3729_v29 = vld [vmem:[#allocation2 + $0x484] ss:$8 sps:$4 sm:$0xff]  }
  0xc1   :  { %2076 = vmatpush1.bf16.msra.mxu0 %v3643_v30  ;;  %v3732_v30 = vld [vmem:[#allocation2 + $0x584] ss:$8 sps:$4 sm:$0xff]   ;;  %v483_v37 = vrot.slane %v455_v31, %v4181_v48  ;;  %v3819_v31 = vld [vmem:[#allocation2 + $0x694] ss:$8 sps:$4 sm:$0xff]  }
  0xc2   :  { %2077 = vmatprep.subr.bf16.mxu0 %v3651_v32  ;;  %v3735_v32 = vld [vmem:[#allocation2 + $0x674] ss:$8 sps:$4 sm:$0xff]  }
  0xc3   :  { %2117 = vmatpush1.bf16.msra.mxu1 %v3646_v33  ;;  %v3730_v33 = vld [vmem:[#allocation2 + $0x580] ss:$8 sps:$4 sm:$0xff]  }
  0xc4   :  { %2118 = vmatprep.subr.bf16.mxu1 %v3654_v35  ;;  %v3738_v35 = vld [vmem:[#allocation2 + $0x774] ss:$8 sps:$4 sm:$0xff]  }
  0xc5   :  { %2078 = vmatpush1.bf16.msra.mxu0 %v3649_v36  ;;  %v3733_v36 = vld [vmem:[#allocation2 + $0x670] ss:$8 sps:$4 sm:$0xff]  }
  0xc6   :  { %2079 = vmatprep.subr.bf16.mxu0 %v3657_v38  ;;  %v3741_v38 = vld [vmem:[#allocation2 + $0x664] ss:$8 sps:$4 sm:$0xff]  }
  0xc7   :  { %2119 = vmatpush1.bf16.msra.mxu1 %v3652_v39  ;;  %v3736_v39 = vld [vmem:[#allocation2 + $0x770] ss:$8 sps:$4 sm:$0xff]  }
  0xc8   :  { %2120 = vmatprep.subr.bf16.mxu1 %v3660_v40  ;;  %v484_v40 = vcombine.high %v462_v34, %v462_v34 }
  0xc9   :  { %2080 = vmatpush1.bf16.msra.mxu0 %v3655_v41  ;;  %v3744_v41 = vld [vmem:[#allocation2 + $0x764] ss:$8 sps:$4 sm:$0xff]  }
  0xca   :  { %2081 = vmatprep.subr.bf16.mxu0 %v3663_v43  ;;  %v3739_v43 = vld [vmem:[#allocation2 + $0x660] ss:$8 sps:$4 sm:$0xff]  }
  0xcb   :  { %2121 = vmatpush1.bf16.msra.mxu1 %v3658_v44  ;;  %v487_v44 = vcombine.high %v483_v37, %v483_v37 }
  0xcc   :  { %2122 = vmatprep.subr.bf16.mxu1 %v3666_v45  ;;  %v3747_v45 = vld [vmem:[#allocation2 + $0x654] ss:$8 sps:$4 sm:$0xff]  }
  0xcd   :  { %2082 = vmatpush1.bf16.msra.mxu0 %v3661_v46  ;;  %v3750_v46 = vld [vmem:[#allocation2 + $0x754] ss:$8 sps:$4 sm:$0xff]  }
  0xce   :  { %2083 = vmatprep.subr.bf16.mxu0 %v3669_v47  ;;  %v3745_v47 = vld [vmem:[#allocation2 + $0x650] ss:$8 sps:$4 sm:$0xff]  }
  0xcf   :  { %2123 = vmatpush1.bf16.msra.mxu1 %v3664_v49  ;;  %v3753_v49 = vld [vmem:[#allocation2 + $0x644] ss:$8 sps:$4 sm:$0xff]  }
  0xd0   :  { %2124 = vmatprep.subr.bf16.mxu1 %v3672_v50  ;;  %v3748_v50 = vld [vmem:[#allocation2 + $0x750] ss:$8 sps:$4 sm:$0xff]  }
  0xd1   :  { %2084 = vmatpush1.bf16.msra.mxu0 %v3667_v51  ;;  %v3756_v51 = vld [vmem:[#allocation2 + $0x744] ss:$8 sps:$4 sm:$0xff]  }
  0xd2   :  { %2085 = vmatprep.subr.bf16.mxu0 %v3675_v52  ;;  %v3751_v52 = vld [vmem:[#allocation2 + $0x640] ss:$8 sps:$4 sm:$0xff]  }
  0xd3   :  { %2125 = vmatpush1.bf16.msra.mxu1 %v3670_v53  ;;  %v3759_v53 = vld [vmem:[#allocation2 + $0x634] ss:$8 sps:$4 sm:$0xff]  }
  0xd4   :  { %2126 = vmatprep.subr.bf16.mxu1 %v3678_v54  ;;  %v3754_v54 = vld [vmem:[#allocation2 + $0x740] ss:$8 sps:$4 sm:$0xff]  }
  0xd5   :  { %2086 = vmatpush1.bf16.msra.mxu0 %v3673_v55  ;;  %v3762_v55 = vld [vmem:[#allocation2 + $0x734] ss:$8 sps:$4 sm:$0xff]  }
  0xd6   :  { %2087 = vmatprep.subr.bf16.mxu0 %v3681_v56  ;;  %v3757_v56 = vld [vmem:[#allocation2 + $0x630] ss:$8 sps:$4 sm:$0xff]  }
  0xd7   :  { %2127 = vmatpush1.bf16.msra.mxu1 %v3676_v57  ;;  %v3765_v57 = vld [vmem:[#allocation2 + $0x624] ss:$8 sps:$4 sm:$0xff]  }
  0xd8   :  { %2128 = vmatprep.subr.bf16.mxu1 %v3684_v58  ;;  %v3760_v58 = vld [vmem:[#allocation2 + $0x730] ss:$8 sps:$4 sm:$0xff]  }
  0xd9   :  { %2088 = vmatpush1.bf16.msra.mxu0 %v3679_v59  ;;  %v3768_v59 = vld [vmem:[#allocation2 + $0x724] ss:$8 sps:$4 sm:$0xff]  }
  0xda   :  { %2089 = vmatprep.subr.bf16.mxu0 %v3687_v60  ;;  %v3763_v60 = vld [vmem:[#allocation2 + $0x620] ss:$8 sps:$4 sm:$0xff]  }
  0xdb   :  { %2129 = vmatpush1.bf16.msra.mxu1 %v3682_v61  ;;  %v3771_v61 = vld [vmem:[#allocation2 + $0x614] ss:$8 sps:$4 sm:$0xff]  }
  0xdc   :  { %2130 = vmatprep.subr.bf16.mxu1 %v3690_v62  ;;  %v3766_v62 = vld [vmem:[#allocation2 + $0x720] ss:$8 sps:$4 sm:$0xff]  }
  0xdd   :  { %2090 = vmatpush2.bf16.msra.mxu0 %v3685_v63  ;;  %v3774_v63 = vld [vmem:[#allocation2 + $0x714] ss:$8 sps:$4 sm:$0xff]  }
  0xde   :  { %2091 = vmatprep.subr.bf16.mxu0 %v3693_v0  ;;  %v3769_v0 = vld [vmem:[#allocation2 + $0x610] ss:$8 sps:$4 sm:$0xff]  }
  0xdf   :  { %2131 = vmatpush2.bf16.msra.mxu1 %v3688_v1  ;;  %v3777_v1 = vld [vmem:[#allocation2 + $0x604] ss:$8 sps:$4 sm:$0xff]  }
  0xe0   :  { %2132 = vmatprep.subr.bf16.mxu1 %v3696_v2  ;;  %v3772_v2 = vld [vmem:[#allocation2 + $0x710] ss:$8 sps:$4 sm:$0xff]  }
  0xe1   :  { %2092 = vmatpush2.bf16.msra.mxu0 %v3691_v3  ;;  %v3780_v3 = vld [vmem:[#allocation2 + $0x704] ss:$8 sps:$4 sm:$0xff]  }
  0xe2   :  { %2093 = vmatprep.subr.bf16.mxu0 %v3699_v4  ;;  %v3775_v4 = vld [vmem:[#allocation2 + $0x600] ss:$8 sps:$4 sm:$0xff]  }
  0xe3   :  { %2133 = vmatpush2.bf16.msra.mxu1 %v3694_v6  ;;  %v3783_v6 = vld [vmem:[#allocation2 + $0x6f4] ss:$8 sps:$4 sm:$0xff]  }
  0xe4   :  { %2134 = vmatprep.subr.bf16.mxu1 %v3702_v7  ;;  %v3778_v7 = vld [vmem:[#allocation2 + $0x700] ss:$8 sps:$4 sm:$0xff]  }
  0xe5   :  { %2094 = vmatpush2.bf16.msra.mxu0 %v3697_v8  ;;  %v3786_v8 = vld [vmem:[#allocation2 + $0x7f4] ss:$8 sps:$4 sm:$0xff]  }
  0xe6   :  { %2095 = vmatprep.subr.bf16.mxu0 %v3705_v9  ;;  %v3781_v9 = vld [vmem:[#allocation2 + $0x6f0] ss:$8 sps:$4 sm:$0xff]  }
  0xe7   :  { %2135 = vmatpush2.bf16.msra.mxu1 %v3700_v10  ;;  %v3789_v10 = vld [vmem:[#allocation2 + $0x6e4] ss:$8 sps:$4 sm:$0xff]  }
  0xe8   :  { %2136 = vmatprep.subr.bf16.mxu1 %v3708_v11  ;;  %v3784_v11 = vld [vmem:[#allocation2 + $0x7f0] ss:$8 sps:$4 sm:$0xff]  }
  0xe9   :  { %2096 = vmatpush2.bf16.msra.mxu0 %v3703_v12  ;;  %v3792_v12 = vld [vmem:[#allocation2 + $0x7e4] ss:$8 sps:$4 sm:$0xff]  }
  0xea   :  { %2097 = vmatprep.subr.bf16.mxu0 %v3711_v13  ;;  %v3787_v13 = vld [vmem:[#allocation2 + $0x6e0] ss:$8 sps:$4 sm:$0xff]  }
  0xeb   :  { %2137 = vmatpush2.bf16.msra.mxu1 %v3706_v14  ;;  %v3795_v14 = vld [vmem:[#allocation2 + $0x6d4] ss:$8 sps:$4 sm:$0xff]  }
  0xec   :  { %2138 = vmatprep.subr.bf16.mxu1 %v3714_v15  ;;  %v3790_v15 = vld [vmem:[#allocation2 + $0x7e0] ss:$8 sps:$4 sm:$0xff]  }
  0xed   :  { %2098 = vmatpush2.bf16.msra.mxu0 %v3709_v16  ;;  %v3798_v16 = vld [vmem:[#allocation2 + $0x7d4] ss:$8 sps:$4 sm:$0xff]  }
  0xee   :  { %2099 = vmatprep.subr.bf16.mxu0 %v3717_v17  ;;  %v3793_v17 = vld [vmem:[#allocation2 + $0x6d0] ss:$8 sps:$4 sm:$0xff]  }
  0xef   :  { %2139 = vmatpush2.bf16.msra.mxu1 %v3712_v18  ;;  %v3801_v18 = vld [vmem:[#allocation2 + $0x6c4] ss:$8 sps:$4 sm:$0xff]  }
  0xf0   :  { %2140 = vmatprep.subr.bf16.mxu1 %v3720_v20  ;;  %v3804_v20 = vld [vmem:[#allocation2 + $0x7c4] ss:$8 sps:$4 sm:$0xff]  }
  0xf1   :  { %2100 = vmatpush2.bf16.msra.mxu0 %v3715_v21  ;;  %v3799_v21 = vld [vmem:[#allocation2 + $0x6c0] ss:$8 sps:$4 sm:$0xff]  }
  0xf2   :  { %2101 = vmatprep.subr.bf16.mxu0 %v3723_v22  ;;  %v3807_v22 = vld [vmem:[#allocation2 + $0x6b4] ss:$8 sps:$4 sm:$0xff]  }
  0xf3   :  { %2141 = vmatpush2.bf16.msra.mxu1 %v3718_v23  ;;  %v3802_v23 = vld [vmem:[#allocation2 + $0x7c0] ss:$8 sps:$4 sm:$0xff]  }
  0xf4   :  { %2142 = vmatprep.subr.bf16.mxu1 %v3726_v25  ;;  %v3810_v25 = vld [vmem:[#allocation2 + $0x7b4] ss:$8 sps:$4 sm:$0xff]  }
  0xf5   :  { %2102 = vmatpush2.bf16.msra.mxu0 %v3721_v26  ;;  %v3805_v26 = vld [vmem:[#allocation2 + $0x6b0] ss:$8 sps:$4 sm:$0xff]  }
  0xf6   :  { %2103 = vmatprep.subr.bf16.mxu0 %v3729_v29  ;;  %v3808_v29 = vld [vmem:[#allocation2 + $0x7b0] ss:$8 sps:$4 sm:$0xff]  }
  0xf7   :  { %2143 = vmatpush2.bf16.msra.mxu1 %v3724_v28  ;;  %v3813_v28 = vld [vmem:[#allocation2 + $0x6a4] ss:$8 sps:$4 sm:$0xff]  }
  0xf8   :  { %2144 = vmatprep.subr.bf16.mxu1 %v3732_v30  ;;  %v3816_v30 = vld [vmem:[#allocation2 + $0x7a4] ss:$8 sps:$4 sm:$0xff]  }
  0xf9   :  { %2104 = vmatpush2.bf16.msra.mxu0 %v3727_v27  ;;  %v3811_v27 = vld [vmem:[#allocation2 + $0x6a0] ss:$8 sps:$4 sm:$0xff]  }
  0xfa   :  { %2155 = vmatprep.subr.bf16.mxu0 %v3735_v32  ;;  %v3814_v32 = vld [vmem:[#allocation2 + $0x7a0] ss:$8 sps:$4 sm:$0xff]  }
  0xfb   :  { %2145 = vmatpush2.bf16.msra.mxu1 %v3730_v33  ;;  %v3822_v33 = vld [vmem:[#allocation2 + $0x794] ss:$8 sps:$4 sm:$0xff]  }
  0xfc   :  { %2106 = vmatmul.mubr.bf16.vlgmr.msra.gmra.mxu0 %v462_v34  ;;  %2196 = vmatprep.subr.bf16.mxu1 %v3738_v35  ;;  %v3817_v34 = vld [vmem:[#allocation2 + $0x690] ss:$8 sps:$4 sm:$0xff]   ;;  %v3825_v35 = vld [vmem:[#allocation2 + $0x684] ss:$8 sps:$4 sm:$0xff]  }
  0xfd   :  { %2156 = vmatpush1.bf16.msra.mxu0 %v3733_v36  ;;  %2187 = vmatprep.mubr.bf16.mxu0 %v483_v37  ;;  %v371_v36 = vsub.s32 0, %v4178_v42  ;;  %v4220_v37 = vld [vmem:[#allocation9] sm:$0xff] }
  0xfe   :  { %2147 = vmatmul.mubr.bf16.vlgmr.msra.gmra.mxu1 %v484_v40  ;;  %2157 = vmatprep.subr.bf16.mxu0 %v3741_v38  ;;  %v4225_v38 = vld.sshfl [vmem:[%s4264_s0 + $0x10] sm:$0x11 pattern:$0x75316420]  ;;  %v375_v40 = vsub.s32 4, %v4178_v42 }
  0xff   :  { %2197 = vmatpush1.bf16.msra.mxu1 %v3736_v39  ;;  %2228 = vmatprep.mubr.bf16.mxu1 %v487_v44  ;;  %v3820_v39 = vld [vmem:[#allocation2 + $0x790] ss:$8 sps:$4 sm:$0xff]   ;;  %v372_v44 = vrot.slane %v4220_v37, %v371_v36 }
 0x100   :  { %2198 = vmatprep.subr.bf16.mxu1 %v3744_v41  ;;  %v3828_v41 = vld [vmem:[#allocation2 + $0x784] ss:$8 sps:$4 sm:$0xff]  }
 0x101   :  { %2158 = vmatpush1.bf16.msra.mxu0 %v3739_v43  ;;  %v3823_v43 = vld [vmem:[#allocation2 + $0x680] ss:$8 sps:$4 sm:$0xff]  }
 0x102   :  { %2159 = vmatprep.subr.bf16.mxu0 %v3747_v45  ;;  %v495_v45 = vcombine.high %v4225_v38, %v4225_v38 }
 0x103   :  { %2199 = vmatpush1.bf16.msra.mxu1 %v3742_v5  ;;  %v469_v5 = vrot.slane %v4212_v24, %v4181_v48 }
 0x104   :  { %2200 = vmatprep.subr.bf16.mxu1 %v3750_v46  ;;  %v3832_v46 = vld [vmem:[#allocation2 + $0x874] ss:$8 sps:$4 sm:$0xff]  }
 0x105   :  { %2160 = vmatpush1.bf16.msra.mxu0 %v3745_v47  ;;  %v3826_v47 = vld [vmem:[#allocation2 + $0x780] ss:$8 sps:$4 sm:$0xff]  }
 0x106   :  { %2161 = vmatprep.subr.bf16.mxu0 %v3753_v49  ;;  %v376_v49 = vrot.slane %v4220_v37, %v375_v40 }
 0x107   :  { %2201 = vmatpush1.bf16.msra.mxu1 %v3748_v50  ;;  %v382_v50 = vrot.slane %v372_v44, %v371_v36 }
 0x108   :  { %2202 = vmatprep.subr.bf16.mxu1 %v3756_v51  ;;  %v3830_v51 = vld [vmem:[#allocation2 + $0x870] ss:$8 sps:$4 sm:$0xff]  }
 0x109   :  { %2162 = vmatpush1.bf16.msra.mxu0 %v3751_v52  ;;  %v509_v52 = vrot.slane %v495_v45, %v4181_v48 }
 0x10a   :  { %2163 = vmatprep.subr.bf16.mxu0 %v3759_v53  ;;  %v485_v53 = vcombine.high %v469_v5, %v469_v5 }
 0x10b   :  { %2203 = vmatpush1.bf16.msra.mxu1 %v3754_v54  ;;  %v3835_v54 = vld [vmem:[#allocation2 + $0x864] ss:$8 sps:$4 sm:$0xff]  }
 0x10c   :  { %2204 = vmatprep.subr.bf16.mxu1 %v3762_v55  ;;  %v386_v55 = vrot.slane %v376_v49, %v371_v36  ;;  %v3877_v49 = vld [vmem:[#allocation4 + $0x14] ss:$8 sps:$4 sm:$0xff]  }
 0x10d   :  { %2164 = vmatpush1.bf16.msra.mxu0 %v3757_v56 }
 0x10e   :  { %2165 = vmatprep.subr.bf16.mxu0 %v3765_v57  ;;  %v3833_v57 = vld [vmem:[#allocation2 + $0x860] ss:$8 sps:$4 sm:$0xff]  }
 0x10f   :  { %2205 = vmatpush1.bf16.msra.mxu1 %v3760_v58 }
 0x110   :  { %2206 = vmatprep.subr.bf16.mxu1 %v3768_v59 }
 0x111   :  { %2166 = vmatpush1.bf16.msra.mxu0 %v3763_v60  ;;  %v3838_v60 = vld [vmem:[#allocation2 + $0x854] ss:$8 sps:$4 sm:$0xff]  }
 0x112   :  { %2167 = vmatprep.subr.bf16.mxu0 %v3771_v61 }
 0x113   :  { %2207 = vmatpush1.bf16.msra.mxu1 %v3766_v62 }
 0x114   :  { %2208 = vmatprep.subr.bf16.mxu1 %v3774_v63 }
 0x115   :  { %2168 = vmatpush1.bf16.msra.mxu0 %v3769_v0 }
 0x116   :  { %2169 = vmatprep.subr.bf16.mxu0 %v3777_v1 }
 0x117   :  { %2209 = vmatpush1.bf16.msra.mxu1 %v3772_v2  ;;  %v3836_v2 = vld [vmem:[#allocation2 + $0x850] ss:$8 sps:$4 sm:$0xff]  }
 0x118   :  { %2210 = vmatprep.subr.bf16.mxu1 %v3780_v3 }
 0x119   :  { %2170 = vmatpush1.bf16.msra.mxu0 %v3775_v4  ;;  %v3841_v4 = vld [vmem:[#allocation2 + $0x844] ss:$8 sps:$4 sm:$0xff]  }
 0x11a   :  { %2171 = vmatprep.subr.bf16.mxu0 %v3783_v6 }
 0x11b   :  { %2211 = vmatpush1.bf16.msra.mxu1 %v3778_v7 }
 0x11c   :  { %2212 = vmatprep.subr.bf16.mxu1 %v3786_v8  ;;  %v3857_v8 = vld [vmem:[#allocation4 + $0x70] ss:$8 sps:$4 sm:$0xff]  }
 0x11d   :  { %2172 = vmatpush2.bf16.msra.mxu0 %v3781_v9  ;;  %v3859_v9 = vld [vmem:[#allocation4 + $0x74] ss:$8 sps:$4 sm:$0xff]  }
 0x11e   :  { %2173 = vmatprep.subr.bf16.mxu0 %v3789_v10  ;;  %v3839_v10 = vld [vmem:[#allocation2 + $0x840] ss:$8 sps:$4 sm:$0xff]  }
 0x11f   :  { %2213 = vmatpush2.bf16.msra.mxu1 %v3784_v11  ;;  %v3862_v11 = vld [vmem:[#allocation4 + $0x64] ss:$8 sps:$4 sm:$0xff]  }
 0x120   :  { %2214 = vmatprep.subr.bf16.mxu1 %v3792_v12  ;;  %v3844_v12 = vld [vmem:[#allocation2 + $0x834] ss:$8 sps:$4 sm:$0xff]  }
 0x121   :  { %2174 = vmatpush2.bf16.msra.mxu0 %v3787_v13  ;;  %v3860_v13 = vld [vmem:[#allocation4 + $0x60] ss:$8 sps:$4 sm:$0xff]  }
 0x122   :  { %2175 = vmatprep.subr.bf16.mxu0 %v3795_v14  ;;  %v3865_v14 = vld [vmem:[#allocation4 + $0x54] ss:$8 sps:$4 sm:$0xff]  }
 0x123   :  { %2215 = vmatpush2.bf16.msra.mxu1 %v3790_v15  ;;  %v3842_v15 = vld [vmem:[#allocation2 + $0x830] ss:$8 sps:$4 sm:$0xff]  }
 0x124   :  { %2216 = vmatprep.subr.bf16.mxu1 %v3798_v16  ;;  %v3847_v16 = vld [vmem:[#allocation2 + $0x824] ss:$8 sps:$4 sm:$0xff]  }
 0x125   :  { %2176 = vmatpush2.bf16.msra.mxu0 %v3793_v17  ;;  %v3863_v17 = vld [vmem:[#allocation4 + $0x50] ss:$8 sps:$4 sm:$0xff]  }
 0x126   :  { %2177 = vmatprep.subr.bf16.mxu0 %v3801_v18  ;;  %v3868_v18 = vld [vmem:[#allocation4 + $0x44] ss:$8 sps:$4 sm:$0xff]  }
 0x127   :  { %2217 = vmatpush2.bf16.msra.mxu1 %v3796_v19  ;;  %v3845_v19 = vld [vmem:[#allocation2 + $0x820] ss:$8 sps:$4 sm:$0xff]  }
 0x128   :  { %2218 = vmatprep.subr.bf16.mxu1 %v3804_v20  ;;  %v3850_v20 = vld [vmem:[#allocation2 + $0x814] ss:$8 sps:$4 sm:$0xff]  }
 0x129   :  { %2178 = vmatpush2.bf16.msra.mxu0 %v3799_v21  ;;  %v3866_v21 = vld [vmem:[#allocation4 + $0x40] ss:$8 sps:$4 sm:$0xff]  }
 0x12a   :  { %2179 = vmatprep.subr.bf16.mxu0 %v3807_v22  ;;  %v4115_v22 = vmov 65535  }
 0x12b   :  { %2219 = vmatpush2.bf16.msra.mxu1 %v3802_v23  ;;  %v1901_v23 = vsel %vm1899_vm1, 4294967295, %v4115_v22 }
 0x12c   :  { %2220 = vmatprep.subr.bf16.mxu1 %v3810_v25  ;;  %v3871_v25 = vld [vmem:[#allocation4 + $0x34] ss:$8 sps:$4 sm:$0xff]  }
 0x12d   :  { %2180 = vmatpush2.bf16.msra.mxu0 %v3805_v26  ;;  %v3848_v26 = vld [vmem:[#allocation2 + $0x810] ss:$8 sps:$4 sm:$0xff]  }
 0x12e   :  { %2181 = vmatprep.subr.bf16.mxu0 %v3813_v28  ;;  %v3853_v28 = vld [vmem:[#allocation2 + $0x804] ss:$8 sps:$4 sm:$0xff]  }
 0x12f   :  { %2221 = vmatpush2.bf16.msra.mxu1 %v3808_v29  ;;  %v3856_v29 = vld [vmem:[#allocation2 + $0x884] ss:$8 sps:$4 sm:$0x3f]  }
 0x130   :  { %2222 = vmatprep.subr.bf16.mxu1 %v3816_v30  ;;  %v1902_v30 = vsel %vm1900_vm2, %v1901_v23, 0  ;;  %v3925_v23 = vld [vmem:[#allocation6 + $0x14] ss:$8 sps:$4 sm:$0xff]  }
 0x131   :  { %2182 = vmatpush2.bf16.msra.mxu0 %v3811_v27  ;;  %v3869_v27 = vld [vmem:[#allocation4 + $0x30] ss:$8 sps:$4 sm:$0xff]  }
 0x132   :  { %2183 = vmatprep.subr.bf16.mxu0 %v3819_v31  ;;  %v3851_v31 = vld [vmem:[#allocation2 + $0x800] ss:$8 sps:$4 sm:$0xff]  }
 0x133   :  { %2223 = vmatpush2.bf16.msra.mxu1 %v3814_v32  ;;  %v3854_v32 = vld [vmem:[#allocation2 + $0x880] ss:$8 sps:$4 sm:$0x3f]  }
 0x134   :  { %2224 = vmatprep.subr.bf16.mxu1 %v3822_v33  ;;  %v1907_v33 = vand.u32 %v3856_v29, %v1902_v30 }
 0x135   :  { %2184 = vmatpush2.bf16.msra.mxu0 %v3817_v34  ;;  %v1904_v34 = vand.u32 %v3854_v32, %v1902_v30 }
 0x136   :  { %2185 = vmatprep.subr.bf16.mxu0 %v3825_v35  ;;  %v502_v35 = vrot.slane %v4225_v38, %v4181_v48  ;;  %v3875_v48 = vld [vmem:[#allocation4 + $0x10] ss:$8 sps:$4 sm:$0xff]  }
 0x137   :  { %2225 = vmatpush2.bf16.msra.mxu1 %v3820_v39  ;;  %v3874_v39 = vld [vmem:[#allocation4 + $0x24] ss:$8 sps:$4 sm:$0xff]  }
 0x138   :  { %2226 = vmatprep.subr.bf16.mxu1 %v3828_v41  ;;  %v3872_v41 = vld [vmem:[#allocation4 + $0x20] ss:$8 sps:$4 sm:$0xff]  }
 0x139   :  { %2186 = vmatpush2.bf16.msra.mxu0 %v3823_v43 }
 0x13a   :  { %2237 = vmatprep.subr.bf16.mxu0 %v3832_v46 }
 0x13b   :  { %2227 = vmatpush2.bf16.msra.mxu1 %v3826_v47 }
 0x13c   :  { %v1943_v56 = vpop.f32.mrf.mxu0  ;;  %2188 = vmatmul.mubr.bf16.vlgmr.msra.gmra.mxu0 %v469_v5  ;;  %2492 = vmatprep.subr.bf16.mxu1 %v3859_v9  ;;  %v3910_v9 = vld [vmem:[#allocation6 + $0x64] ss:$8 sps:$4 sm:$0xff]  }
 0x13d   :  { %v1944_v24 = vadd.f32 %v1943_v56, %v382_v50  ;;  %2238 = vmatpush1.bf16.msra.mxu0 %v3830_v51  ;;  %3337 = vmatprep.mubr.msk.bf16.mxu0 %vm1895_vm0, %v509_v52  ;;  %v3880_v52 = vld [vmem:[#allocation4 + $0x4] ss:$8 sps:$4 sm:$0xff]   ;;  %v3881_v56 = vld [vmem:[#allocation4 + $0xf0] ss:$8 sps:$4 sm:$0xff]  }
 0x13e   :  { %v1945_v58 = vpop.f32.mrf.mxu0  ;;  %v1984_v59 = vpop.f32.mrf.mxu1  ;;  %2229 = vmatmul.mubr.bf16.vlgmr.msra.gmra.mxu1 %v485_v53  ;;  %2239 = vmatprep.subr.bf16.mxu0 %v3835_v54  ;;  %v3878_v53 = vld [vmem:[#allocation4] ss:$8 sps:$4 sm:$0xff]  }
 0x13f   :  { %v1946_v61 = vadd.f32 %v1945_v58, %v386_v55  ;;  %v4235_v62 = vadd.f32 %v1984_v59, %v1944_v24  ;;  %2493 = vmatpush1.bf16.msra.mxu1 %v3857_v8  ;;  %v3883_v55 = vld [vmem:[#allocation4 + $0xf4] ss:$8 sps:$4 sm:$0xff]   ;;  %v3886_v24 = vld [vmem:[#allocation4 + $0xe4] ss:$8 sps:$4 sm:$0xff]   ;;  %v3887_v59 = vld [vmem:[#allocation4 + $0xd0] ss:$8 sps:$4 sm:$0xff]  }
 0x140   :  { %v1947_v63 = vpop.f32.mrf.mxu0  ;;  %v1986_v0 = vpop.f32.mrf.mxu1  ;;  %2494 = vmatprep.subr.bf16.mxu1 %v3862_v11  ;;  %v3889_v58 = vld [vmem:[#allocation4 + $0xd4] ss:$8 sps:$4 sm:$0xff]  }
 0x141   :  { %v4237_v1 = vadd.f32 %v1986_v0, %v1946_v61  ;;  %2240 = vmatpush1.bf16.msra.mxu0 %v3833_v57  ;;  %v3884_v57 = vld [vmem:[#allocation4 + $0xe0] ss:$8 sps:$4 sm:$0xff]   ;;  %v3893_v63 = vld [vmem:[#allocation4 + $0xb0] ss:$8 sps:$4 sm:$0xff]   ;;  %v3898_v0 = vld [vmem:[#allocation4 + $0xa4] ss:$8 sps:$4 sm:$0xff]  }
 0x142   :  { %v1948_v3 = vpop.f32.mrf.mxu0  ;;  %2241 = vmatprep.subr.bf16.mxu0 %v3838_v60  ;;  %v1988_v6 = vpop.f32.mrf.mxu1  ;;  %v3892_v60 = vld [vmem:[#allocation4 + $0xc4] ss:$8 sps:$4 sm:$0xff]   ;;  %v3890_v61 = vld [vmem:[#allocation4 + $0xc0] ss:$8 sps:$4 sm:$0xff]   ;;  %v3907_v8 = vld [vmem:[#allocation6 + $0x74] ss:$8 sps:$4 sm:$0xff]  }
 0x143   :  { %2495 = vmatpush1.bf16.msra.mxu1 %v3860_v13  ;;  %v3899_v3 = vld [vmem:[#allocation4 + $0x90] ss:$8 sps:$4 sm:$0xff]   ;;  %v3902_v6 = vld [vmem:[#allocation4 + $0x80] ss:$8 sps:$4 sm:$0xff]   ;;  %v3913_v11 = vld [vmem:[#allocation6 + $0x54] ss:$8 sps:$4 sm:$0xff]  }
 0x144   :  { %v1989_v7 = vpop.f32.mrf.mxu1  ;;  %2496 = vmatprep.subr.bf16.mxu1 %v3865_v14  ;;  %v3916_v13 = vld [vmem:[#allocation6 + $0x44] ss:$8 sps:$4 sm:$0xff]   ;;  %v3914_v14 = vld [vmem:[#allocation6 + $0x40] ss:$8 sps:$4 sm:$0xff]  }
 0x145   :  { %2242 = vmatpush1.bf16.msra.mxu0 %v3836_v2  ;;  %v3901_v2 = vld [vmem:[#allocation4 + $0x94] ss:$8 sps:$4 sm:$0xff]   ;;  %v3905_v7 = vld [vmem:[#allocation6 + $0x70] ss:$8 sps:$4 sm:$0xff]  }
 0x146   :  { %2243 = vmatprep.subr.bf16.mxu0 %v3841_v4  ;;  %v3904_v4 = vld [vmem:[#allocation4 + $0x84] ss:$8 sps:$4 sm:$0xff]  }
 0x147   :  { %2497 = vmatpush1.bf16.msra.mxu1 %v3863_v17  ;;  %v3922_v17 = vld [vmem:[#allocation6 + $0x24] ss:$8 sps:$4 sm:$0xff]  }
 0x148   :  { %2498 = vmatprep.subr.bf16.mxu1 %v3868_v18 }
 0x149   :  { %2244 = vmatpush1.bf16.msra.mxu0 %v3839_v10  ;;  %v3908_v10 = vld [vmem:[#allocation6 + $0x60] ss:$8 sps:$4 sm:$0xff]  }
 0x14a   :  { %2245 = vmatprep.subr.bf16.mxu0 %v3844_v12  ;;  %v3911_v12 = vld [vmem:[#allocation6 + $0x50] ss:$8 sps:$4 sm:$0xff]  }
 0x14b   :  { %2499 = vmatpush1.bf16.msra.mxu1 %v3866_v21 }
 0x14c   :  { %2500 = vmatprep.subr.bf16.mxu1 %v3871_v25 }
 0x14d   :  { %2246 = vmatpush1.bf16.msra.mxu0 %v3842_v15  ;;  %v3919_v15 = vld [vmem:[#allocation6 + $0x34] ss:$8 sps:$4 sm:$0xff]  }
 0x14e   :  { %2247 = vmatprep.subr.bf16.mxu0 %v3847_v16  ;;  %v3917_v16 = vld [vmem:[#allocation6 + $0x30] ss:$8 sps:$4 sm:$0xff]  }
 0x14f   :  { %2501 = vmatpush1.bf16.msra.mxu1 %v3869_v27  ;;  %v3923_v27 = vld [vmem:[#allocation6 + $0x10] ss:$8 sps:$4 sm:$0xff]  }
 0x150   :  { %2502 = vmatprep.subr.bf16.mxu1 %v3874_v39  ;;  %v3929_v39 = vld [vmem:[#allocation6 + $0xf0] ss:$8 sps:$4 sm:$0xff]  }
 0x151   :  { %2248 = vmatpush1.bf16.msra.mxu0 %v3845_v19 }
 0x152   :  { %2249 = vmatprep.subr.bf16.mxu0 %v3850_v20  ;;  %v3920_v20 = vld [vmem:[#allocation6 + $0x20] ss:$8 sps:$4 sm:$0xff]  }
 0x153   :  { %2503 = vmatpush1.bf16.msra.mxu1 %v3872_v41  ;;  %v3932_v41 = vld [vmem:[#allocation6 + $0xe0] ss:$8 sps:$4 sm:$0xff]  }
 0x154   :  { %2504 = vmatprep.subr.bf16.mxu1 %v3877_v49  ;;  %v3946_v49 = vld [vmem:[#allocation6 + $0xa4] ss:$8 sps:$4 sm:$0xff]  }
 0x155   :  { %2250 = vmatpush1.bf16.msra.mxu0 %v3848_v26 }
 0x156   :  { %2251 = vmatprep.subr.bf16.mxu0 %v3853_v28 }
 0x157   :  { %2505 = vmatpush1.bf16.msra.mxu1 %v3875_v48 }
 0x158   :  { %2506 = vmatprep.subr.bf16.mxu1 %v3880_v52 }
 0x159   :  { %2252 = vmatpush1.bf16.msra.mxu0 %v3851_v31 }
 0x15a   :  { %2267 = vmatprep.subr.bf16.mxu0 %v1907_v33  ;;  %v3928_v33 = vld [vmem:[#allocation6 + $0x4] ss:$8 sps:$4 sm:$0xff]  }
 0x15b   :  { %2507 = vmatpush1.bf16.msra.mxu1 %v3878_v53 }
 0x15c   :  { %2508 = vmatprep.subr.bf16.mxu1 %v3883_v55 }
 0x15d   :  { %2268 = vmatpush2.bf16.msra.mxu0 %v1904_v34 }
 0x15e   :  { %2747 = vmatprep.subr.bf16.mxu0 %v3907_v8  ;;  %v3947_v8 = vld [vmem:[#allocation6 + $0x90] ss:$8 sps:$4 sm:$0xff]  }
 0x15f   :  { %2509 = vmatpush2.bf16.msra.mxu1 %v3881_v56 }
 0x160   :  { %2270 = vmatmul.mubr.bf16.vlgmr.msra.gmra.mxu0 %v502_v35  ;;  %2510 = vmatprep.subr.bf16.mxu1 %v3886_v24  ;;  %v3926_v35 = vld [vmem:[#allocation6] ss:$8 sps:$4 sm:$0xff]  }
 0x161   :  { %2748 = vmatpush1.bf16.msra.mxu0 %v3905_v7  ;;  %v3949_v7 = vld [vmem:[#allocation6 + $0x94] ss:$8 sps:$4 sm:$0xff]  }
 0x162   :  { %2749 = vmatprep.subr.bf16.mxu0 %v3910_v9  ;;  %v3952_v9 = vld [vmem:[#allocation6 + $0x84] ss:$8 sps:$4 sm:$0xff]  }
 0x163   :  { %2511 = vmatpush2.bf16.msra.mxu1 %v3884_v57 }
 0x164   :  { %2512 = vmatprep.subr.bf16.mxu1 %v3889_v58 }
 0x165   :  { %2750 = vmatpush1.bf16.msra.mxu0 %v3908_v10  ;;  %v3950_v10 = vld [vmem:[#allocation6 + $0x80] ss:$8 sps:$4 sm:$0xff]  }
 0x166   :  { %2751 = vmatprep.subr.bf16.mxu0 %v3913_v11  ;;  %v3953_v11 = vld [vmem:[#allocation7 + $0x70] ss:$8 sps:$4 sm:$0xff]  }
 0x167   :  { %2513 = vmatpush2.bf16.msra.mxu1 %v3887_v59 }
 0x168   :  { %2514 = vmatprep.subr.bf16.mxu1 %v3892_v60 }
 0x169   :  { %2752 = vmatpush1.bf16.msra.mxu0 %v3911_v12  ;;  %v3955_v12 = vld [vmem:[#allocation7 + $0x74] ss:$8 sps:$4 sm:$0xff]  }
 0x16a   :  { %2753 = vmatprep.subr.bf16.mxu0 %v3916_v13  ;;  %v3958_v13 = vld [vmem:[#allocation7 + $0x64] ss:$8 sps:$4 sm:$0xff]  }
 0x16b   :  { %2515 = vmatpush2.bf16.msra.mxu1 %v3890_v61 }
 0x16d   :  { %2754 = vmatpush1.bf16.msra.mxu0 %v3914_v14  ;;  %v3956_v14 = vld [vmem:[#allocation7 + $0x60] ss:$8 sps:$4 sm:$0xff]  }
 0x16e   :  { %2755 = vmatprep.subr.bf16.mxu0 %v3919_v15  ;;  %v3961_v15 = vld [vmem:[#allocation7 + $0x54] ss:$8 sps:$4 sm:$0xff]  }
 0x171   :  { %2756 = vmatpush1.bf16.msra.mxu0 %v3917_v16  ;;  %v3959_v16 = vld [vmem:[#allocation7 + $0x50] ss:$8 sps:$4 sm:$0xff]  }
 0x172   :  { %2757 = vmatprep.subr.bf16.mxu0 %v3922_v17  ;;  %v3964_v17 = vld [vmem:[#allocation7 + $0x44] ss:$8 sps:$4 sm:$0xff]  }
 0x175   :  { %2758 = vmatpush1.bf16.msra.mxu0 %v3920_v20  ;;  %v3965_v20 = vld [vmem:[#allocation7 + $0x30] ss:$8 sps:$4 sm:$0xff]  }
 0x176   :  { %2759 = vmatprep.subr.bf16.mxu0 %v3925_v23  ;;  %v3973_v23 = vld [vmem:[#allocation7 + $0x14] ss:$8 sps:$4 sm:$0xff]  }
 0x179   :  { %2760 = vmatpush1.bf16.msra.mxu0 %v3923_v27  ;;  %v3982_v27 = vld [vmem:[#allocation7 + $0xe4] ss:$8 sps:$4 sm:$0xff]  }
 0x17a   :  { %2761 = vmatprep.subr.bf16.mxu0 %v3928_v33  ;;  %v3983_v33 = vld [vmem:[#allocation7 + $0xd0] ss:$8 sps:$4 sm:$0xff]  }
 0x17c   :  { %v2025_v36 = vpop.f32.mrf.mxu0 }
 0x17d   :  { %v2026_v40 = vadd.f32 %v2025_v36, %v4235_v62  ;;  %v3895_v62 = vld [vmem:[#allocation4 + $0xb4] ss:$8 sps:$4 sm:$0xff]   ;;  %2762 = vmatpush1.bf16.msra.mxu0 %v3926_v35  ;;  %v3986_v35 = vld [vmem:[#allocation7 + $0xc0] ss:$8 sps:$4 sm:$0xff]  }
 0x17e   :  { %v2027_v43 = vpop.f32.mrf.mxu0  ;;  %v2066_v44 = vpop.f32.mrf.mxu1  ;;  %2516 = vmatprep.subr.bf16.mxu1 %v3895_v62  ;;  %v3931_v36 = vld [vmem:[#allocation6 + $0xf4] ss:$8 sps:$4 sm:$0xff]  }
 0x17f   :  { %v2028_v45 = vadd.f32 %v2027_v43, %v4237_v1  ;;  %v4243_v5 = vadd.f32 %v2066_v44, %v2026_v40  ;;  %2517 = vmatpush2.bf16.msra.mxu1 %v3893_v63  ;;  %v3896_v1 = vld [vmem:[#allocation4 + $0xa0] ss:$8 sps:$4 sm:$0xff]   ;;  %2763 = vmatprep.subr.bf16.mxu0 %v3931_v36  ;;  %v3934_v40 = vld [vmem:[#allocation6 + $0xe4] ss:$8 sps:$4 sm:$0xff]   ;;  %v3937_v43 = vld [vmem:[#allocation6 + $0xd4] ss:$8 sps:$4 sm:$0xff]  }
 0x180   :  { %v2029_v46 = vpop.f32.mrf.mxu0  ;;  %v2068_v47 = vpop.f32.mrf.mxu1  ;;  %2518 = vmatprep.subr.bf16.mxu1 %v3898_v0  ;;  %v3935_v44 = vld [vmem:[#allocation6 + $0xd0] ss:$8 sps:$4 sm:$0xff]   ;;  %v3991_v36 = vld [vmem:[#allocation7 + $0xb4] ss:$8 sps:$4 sm:$0xff]  }
 0x181   :  { %v4245_v50 = vadd.f32 %v2068_v47, %v2028_v45  ;;  %2764 = vmatpush2.bf16.msra.mxu0 %v3929_v39  ;;  %v3940_v45 = vld [vmem:[#allocation6 + $0xc4] ss:$8 sps:$4 sm:$0xff]   ;;  %v3943_v46 = vld [vmem:[#allocation6 + $0xb4] ss:$8 sps:$4 sm:$0xff]   ;;  %v3941_v47 = vld [vmem:[#allocation6 + $0xb0] ss:$8 sps:$4 sm:$0xff]  }
 0x182   :  { %v2030_v38 = vpop.f32.mrf.mxu0  ;;  %v2070_v51 = vpop.f32.mrf.mxu1  ;;  %2765 = vmatprep.subr.bf16.mxu0 %v3934_v40  ;;  %v3989_v39 = vld [vmem:[#allocation7 + $0xb0] ss:$8 sps:$4 sm:$0xff]   ;;  %v3994_v40 = vld [vmem:[#allocation7 + $0xa4] ss:$8 sps:$4 sm:$0xff]  }
 0x183   :  { %2519 = vmatpush2.bf16.msra.mxu1 %v3896_v1 }
 0x184   :  { %v2071_v54 = vpop.f32.mrf.mxu1  ;;  %2520 = vmatprep.subr.bf16.mxu1 %v3901_v2 }
 0x185   :  { %2766 = vmatpush2.bf16.msra.mxu0 %v3932_v41  ;;  %v3992_v41 = vld [vmem:[#allocation7 + $0xa0] ss:$8 sps:$4 sm:$0xff]  }
 0x186   :  { %2767 = vmatprep.subr.bf16.mxu0 %v3937_v43  ;;  %v2316_v43 = vsub.s32 1, %v4178_v42 }
 0x187   :  { %2521 = vmatpush2.bf16.msra.mxu1 %v3899_v3 }
 0x188   :  { %2522 = vmatprep.subr.bf16.mxu1 %v3904_v4 }
 0x189   :  { %2768 = vmatpush2.bf16.msra.mxu0 %v3935_v44  ;;  %v2320_v44 = vsub.s32 5, %v4178_v42 }
 0x18a   :  { %2769 = vmatprep.subr.bf16.mxu0 %v3940_v45  ;;  %v2317_v45 = vrot.slane %v4220_v37, %v2316_v43 }
 0x18b   :  { %2523 = vmatpush2.bf16.msra.mxu1 %v3902_v6 }
 0x18c   :  { %3002 = vmatprep.subr.bf16.mxu1 %v3955_v12 }
 0x1bc   :  { %v2107_v18 = vpop.f32.mrf.mxu0 }
 0x1bd   :  { %v2108_v19 = vadd.f32 %v2107_v18, %v4243_v5  ;;  %v3938_v5 = vld [vmem:[#allocation6 + $0xc0] ss:$8 sps:$4 sm:$0xff]  }
 0x1be   :  { %v2109_v21 = vpop.f32.mrf.mxu0  ;;  %v2148_v22 = vpop.f32.mrf.mxu1  ;;  %2770 = vmatpush2.bf16.msra.mxu0 %v3938_v5  ;;  %v3962_v18 = vld [vmem:[#allocation7 + $0x40] ss:$8 sps:$4 sm:$0xff]   ;;  %v2321_v5 = vrot.slane %v4220_v37, %v2320_v44 }
 0x1bf   :  { %v2110_v25 = vadd.f32 %v2109_v21, %v4245_v50  ;;  %v2149_v26 = vadd.f32 %v2148_v22, %v2108_v19  ;;  %2771 = vmatprep.subr.bf16.mxu0 %v3943_v46  ;;  %v3944_v50 = vld [vmem:[#allocation6 + $0xa0] ss:$8 sps:$4 sm:$0xff]   ;;  %v3967_v19 = vld [vmem:[#allocation7 + $0x34] ss:$8 sps:$4 sm:$0xff]   ;;  %v3970_v21 = vld [vmem:[#allocation7 + $0x24] ss:$8 sps:$4 sm:$0xff]   ;;  %v2327_v46 = vrot.slane %v2317_v45, %v2316_v43 }
 0x1c0   :  { %v2111_v28 = vpop.f32.mrf.mxu0  ;;  %v2150_v29 = vpop.f32.mrf.mxu1  ;;  %v3968_v22 = vld [vmem:[#allocation7 + $0x20] ss:$8 sps:$4 sm:$0xff]  }
 0x1c1   :  { %v2151_v30 = vadd.f32 %v2150_v29, %v2110_v25  ;;  %v3971_v25 = vld [vmem:[#allocation7 + $0x10] ss:$8 sps:$4 sm:$0xff]   ;;  %v3974_v28 = vld [vmem:[#allocation7] ss:$8 sps:$4 sm:$0xff]   ;;  %v3979_v29 = vld [vmem:[#allocation7 + $0xf4] ss:$8 sps:$4 sm:$0xff]  }
 0x1c2   :  { %v2112_v31 = vpop.f32.mrf.mxu0  ;;  %v2152_v32 = vpop.f32.mrf.mxu1  ;;  %2772 = vmatpush2.bf16.msra.mxu0 %v3941_v47  ;;  %v2331_v47 = vrot.slane %v2321_v5, %v2316_v43 }
 0x1c3   :  { %2773 = vmatprep.subr.bf16.mxu0 %v3946_v49  ;;  %v3980_v31 = vld [vmem:[#allocation7 + $0xe0] ss:$8 sps:$4 sm:$0xff]   ;;  %v3985_v32 = vld [vmem:[#allocation7 + $0xd4] ss:$8 sps:$4 sm:$0xff]  }
 0x1c4   :  { %v2153_v34 = vpop.f32.mrf.mxu1 }
 0x1c5   :  { %v3988_v34 = vld [vmem:[#allocation7 + $0xc4] ss:$8 sps:$4 sm:$0xff]  }
 0x1c6   :  { %2774 = vmatpush2.bf16.msra.mxu0 %v3944_v50 }
 0x1c7   :  { %2775 = vmatprep.subr.bf16.mxu0 %v3949_v7 }
 0x1ca   :  { %2776 = vmatpush2.bf16.msra.mxu0 %v3947_v8 }
 0x1cb   :  { %2777 = vmatprep.subr.bf16.mxu0 %v3952_v9 }
 0x1ce   :  { %2778 = vmatpush2.bf16.msra.mxu0 %v3950_v10 }
 0x1fc   :  { %v2189_v48 = vpop.f32.mrf.mxu0 }
 0x1fd   :  { %v2190_v24 = vadd.f32 %v2189_v48, %v2149_v26  ;;  %v3976_v26 = vld [vmem:[#allocation7 + $0x4] ss:$8 sps:$4 sm:$0xff]  }
 0x1fe   :  { %v2191_v38 = vpop.f32.mrf.mxu0  ;;  %v2230_v51 = vpop.f32.mrf.mxu1 }
 0x1ff   :  { %v2192_v57 = vadd.f32 %v2191_v38, %v2151_v30  ;;  %v2231_v58 = vadd.f32 %v2230_v51, %v2190_v24  ;;  %v3977_v30 = vld [vmem:[#allocation7 + $0xf0] ss:$8 sps:$4 sm:$0xff]   ;;  %v3997_v24 = vld [vmem:[#allocation7 + $0x94] ss:$8 sps:$4 sm:$0xff]  }
 0x200   :  { %v2193_v52 = vpop.f32.mrf.mxu0  ;;  %v2232_v53 = vpop.f32.mrf.mxu1 }
 0x201   :  { %v2233_v60 = vadd.f32 %v2232_v53, %v2192_v57  ;;  %v3995_v57 = vld [vmem:[#allocation7 + $0x90] ss:$8 sps:$4 sm:$0xff]  }
 0x202   :  { %v2194_v54 = vpop.f32.mrf.mxu0  ;;  %v2234_v55 = vpop.f32.mrf.mxu1 }
 0x204   :  { %v2235_v56 = vpop.f32.mrf.mxu1 }
 0x220   :  { %v2271_v59 = vpop.f32.mrf.mxu0 }
 0x221   :  { %v2272_v61 = vadd.f32 %v2271_v59, %v2231_v58  ;;  %v4000_v58 = vld [vmem:[#allocation7 + $0x84] ss:$8 sps:$4 sm:$0xff]   ;;  %v3998_v59 = vld [vmem:[#allocation7 + $0x80] ss:$8 sps:$4 sm:$0xff]  }
 0x222   :  { %v2273_v62 = vpop.f32.mrf.mxu0 }
 0x223   :  { %v2274_v63 = vadd.f32 %v2273_v62, %v2233_v60  ;;  %v2278_v0 = vmax.f32 %v2272_v61, 0.0  ;;  %v2571_v60 = vsub.s32 2, %v4178_v42  ;;  %v2575_v61 = vsub.s32 6, %v4178_v42 }
 0x224   :  { %v2275_v1 = vpop.f32.mrf.mxu0 }
 0x225   :  { %v2279_v2 = vmax.f32 %v2274_v63, 0.0  ;;  %v2280_v6 = vpack.c.bf16 %v2278_v0, %v2278_v0  ;;  %v2572_v62 = vrot.slane %v4220_v37, %v2571_v60  ;;  %v2576_v63 = vrot.slane %v4220_v37, %v2575_v61 }
 0x226   :  { %v2276_v3 = vpop.f32.mrf.mxu0 }
 0x227   :  { %v2281_v4 = vpack.c.bf16 %v2279_v2, %v2279_v2  ;;  %v2582_v0 = vrot.slane %v2572_v62, %v2571_v60  ;;  %v2586_v1 = vrot.slane %v2576_v63, %v2571_v60 }
 0x229   :  { %2524 = vmatprep.mubr.bf16.mxu1 %v2281_v4 }
 0x22a   :  { %2525 = vmatmul.mubr.bf16.vlgmr.msra.gmra.mxu1 %v2280_v6 }
 0x22b   :  { %3003 = vmatpush1.bf16.msra.mxu1 %v3953_v11 }
 0x22c   :  { %3004 = vmatprep.subr.bf16.mxu1 %v3958_v13  ;;  %v2826_v13 = vsub.s32 3, %v4178_v42 }
 0x22f   :  { %3005 = vmatpush1.bf16.msra.mxu1 %v3956_v14  ;;  %v2830_v14 = vsub.s32 7, %v4178_v42 }
 0x230   :  { %3006 = vmatprep.subr.bf16.mxu1 %v3961_v15  ;;  %v2827_v15 = vrot.slane %v4220_v37, %v2826_v13 }
 0x233   :  { %3007 = vmatpush1.bf16.msra.mxu1 %v3959_v16  ;;  %v2831_v16 = vrot.slane %v4220_v37, %v2830_v14 }
 0x234   :  { %3008 = vmatprep.subr.bf16.mxu1 %v3964_v17  ;;  %v2837_v17 = vrot.slane %v2827_v15, %v2826_v13 }
 0x237   :  { %3009 = vmatpush1.bf16.msra.mxu1 %v3962_v18  ;;  %v2841_v18 = vrot.slane %v2831_v16, %v2826_v13 }
 0x238   :  { %3010 = vmatprep.subr.bf16.mxu1 %v3967_v19 }
 0x23b   :  { %3011 = vmatpush1.bf16.msra.mxu1 %v3965_v20 }
 0x23c   :  { %3012 = vmatprep.subr.bf16.mxu1 %v3970_v21 }
 0x23f   :  { %3013 = vmatpush1.bf16.msra.mxu1 %v3968_v22 }
 0x240   :  { %3014 = vmatprep.subr.bf16.mxu1 %v3973_v23 }
 0x243   :  { %3015 = vmatpush1.bf16.msra.mxu1 %v3971_v25 }
 0x244   :  { %3016 = vmatprep.subr.bf16.mxu1 %v3976_v26 }
 0x247   :  { %3017 = vmatpush1.bf16.msra.mxu1 %v3974_v28 }
 0x248   :  { %3018 = vmatprep.subr.bf16.mxu1 %v3979_v29 }
 0x24b   :  { %3019 = vmatpush2.bf16.msra.mxu1 %v3977_v30 }
 0x24c   :  { %3020 = vmatprep.subr.bf16.mxu1 %v3982_v27 }
 0x24f   :  { %3021 = vmatpush2.bf16.msra.mxu1 %v3980_v31 }
 0x250   :  { %3022 = vmatprep.subr.bf16.mxu1 %v3985_v32 }
 0x253   :  { %3023 = vmatpush2.bf16.msra.mxu1 %v3983_v33 }
 0x254   :  { %3024 = vmatprep.subr.bf16.mxu1 %v3988_v34 }
 0x257   :  { %3025 = vmatpush2.bf16.msra.mxu1 %v3986_v35 }
 0x258   :  { %3026 = vmatprep.subr.bf16.mxu1 %v3991_v36 }
 0x25b   :  { %3027 = vmatpush2.bf16.msra.mxu1 %v3989_v39 }
 0x25c   :  { %3028 = vmatprep.subr.bf16.mxu1 %v3994_v40 }
 0x25f   :  { %3029 = vmatpush2.bf16.msra.mxu1 %v3992_v41 }
 0x260   :  { %3030 = vmatprep.subr.bf16.mxu1 %v3997_v24 }
 0x263   :  { %3031 = vmatpush2.bf16.msra.mxu1 %v3995_v57 }
 0x264   :  { %3032 = vmatprep.subr.bf16.mxu1 %v4000_v58 }
 0x267   :  { %3033 = vmatpush2.bf16.msra.mxu1 %v3998_v59 }
 0x2ea   :  { %v2526_v49 = vpop.f32.mrf.mxu1 }
 0x2eb   :  { %v2527_v50 = vadd.f32 %v2526_v49, %v2327_v46 }
 0x2ec   :  { %v2528_v48 = vpop.f32.mrf.mxu1 }
 0x2ed   :  { %v2529_v38 = vadd.f32 %v2528_v48, %v2331_v47  ;;  %v2533_v51 = vmax.f32 %v2527_v50, 0.0 }
 0x2ee   :  { %v2530_v52 = vpop.f32.mrf.mxu1 }
 0x2ef   :  { %v2534_v53 = vmax.f32 %v2529_v38, 0.0  ;;  %v2535_v56 = vpack.c.bf16 %v2533_v51, %v2533_v51 }
 0x2f0   :  { %v2531_v54 = vpop.f32.mrf.mxu1 }
 0x2f1   :  { %v2536_v55 = vpack.c.bf16 %v2534_v53, %v2534_v53 }
 0x2f3   :  { %2779 = vmatprep.mubr.bf16.mxu0 %v2536_v55 }
 0x2f4   :  { %2780 = vmatmul.mubr.bf16.vlgmr.msra.gmra.mxu0 %v2535_v56 }
 0x3b4   :  { %v2781_v2 = vpop.f32.mrf.mxu0 }
 0x3b5   :  { %v2782_v3 = vadd.f32 %v2781_v2, %v2582_v0 }
 0x3b6   :  { %v2783_v4 = vpop.f32.mrf.mxu0 }
 0x3b7   :  { %v2784_v6 = vadd.f32 %v2783_v4, %v2586_v1  ;;  %v2788_v7 = vmax.f32 %v2782_v3, 0.0 }
 0x3b8   :  { %v2785_v8 = vpop.f32.mrf.mxu0 }
 0x3b9   :  { %v2789_v9 = vmax.f32 %v2784_v6, 0.0  ;;  %v2790_v12 = vpack.c.bf16 %v2788_v7, %v2788_v7 }
 0x3ba   :  { %v2786_v10 = vpop.f32.mrf.mxu0 }
 0x3bb   :  { %v2791_v11 = vpack.c.bf16 %v2789_v9, %v2789_v9 }
 0x3bd   :  { %3034 = vmatprep.mubr.bf16.mxu1 %v2791_v11 }
 0x3be   :  { %3035 = vmatmul.mubr.bf16.vlgmr.msra.gmra.mxu1 %v2790_v12 }
 0x47e   :  { %v3036_v19 = vpop.f32.mrf.mxu1 }
 0x47f   :  { %v3037_v21 = vadd.f32 %v3036_v19, %v2837_v17 }
 0x480   :  { %v3038_v20 = vpop.f32.mrf.mxu1 }
 0x481   :  { %v3039_v22 = vadd.f32 %v3038_v20, %v2841_v18 }
 0x482   :  { %v3040_v23 = vpop.f32.mrf.mxu1 }
 0x483   :  { %v3045_v25 = vcombine.low %v3037_v21, %v3039_v22 }
 0x484   :  { %v3041_v26 = vpop.f32.mrf.mxu1 }
 0x485   :  { %3434 = vst.sshfl [vmem:[%s4270_s6] sm:$0x33 pattern:$0x76325410] %v3045_v25 }
 0x486   :  { %3059 = vsyncpa [#allocation3], 1 }
 0x487   :  { %3060 = vsyncpa [#allocation5], 1 }
 0x488   :  { %3061 = vsyncpa [#allocation8], 1 }

</bundles_post_ra>
